<compile_context>
chip_gen: v7x
topology: tpu7x:2x2x1
jax: 0.10.0
libtpu: 0.0.40
codegen_flags: <defaults>
</compile_context>

<pallas_src>
import math
import numpy as np

import jax
import jax.numpy as jnp
from jax.experimental import pallas as pl
from jax.experimental.pallas import tpu as pltpu


def _round_up(x, m):
    return (x + m - 1) // m * m


# ------------------------------------------------------------------ kernel ---

def _make_block_kernel(stride, ho, wo, equal_in_out, neg_slope=0.1):
    """Fully fused BasicBlock kernel (one batch element per grid step).

    refs (inputs / outputs / scratch):
      x_ref  : (n_phase, Hp, Wp, Cin_p)  bf16   phase-split, spatially padded,
                                               BN1/LeakyReLU pre-activated input
      r_ref  : (Ho, Wo, Cres_p)          f32 (equal_in_out) / bf16 (shortcut)
      w1_ref : (9, Cin_p, Cout_p)        bf16   conv1 per-tap matrices
      w2_ref : (9, Cout_p, Cout_p)       bf16   conv2 per-tap matrices
      s2_ref, b2_ref : (1, Cout_p)       f32    folded BN2 scale / bias
      [wsc_ref : (Cin_p, Cout_p)         bf16   1x1 shortcut conv, non-equal only]
      o_ref  : (Ho, Wo, Cout_p)          f32
      a2_ref : (Ho+2, Wo+2, Cout_p)      bf16   VMEM-resident conv1 activation
    """
    m = ho * wo

    def tap_pos(dy, dx):
        if stride == 1:
            return 0, dy, dx
        return (dy % 2) * 2 + (dx % 2), dy // 2, dx // 2

    def kernel(*refs):
        if equal_in_out:
            x_ref, r_ref, w1_ref, w2_ref, s2_ref, b2_ref, o_ref, a2_ref = refs
            wsc_ref = None
        else:
            (x_ref, r_ref, w1_ref, w2_ref, s2_ref, b2_ref,
             wsc_ref, o_ref, a2_ref) = refs
        cout_p = o_ref.shape[-1]

        # ---- conv1 (3x3, stride): 9 shifted-tap dots, bf16 MXU / f32 acc ----
        acc = jnp.zeros((m, cout_p), jnp.float32)
        for dy in range(3):
            for dx in range(3):
                ph, oy, ox = tap_pos(dy, dx)
                tap = x_ref[ph, oy:oy + ho, ox:ox + wo, :]
                acc = acc + jnp.dot(tap.reshape(m, tap.shape[-1]),
                                    w1_ref[dy * 3 + dx],
                                    preferred_element_type=jnp.float32)

        # ---- fused BN2 + LeakyReLU epilogue (f32 VPU) ----
        y = acc * s2_ref[...] + b2_ref[...]
        y = jnp.where(y >= 0, y, neg_slope * y)

        # ---- stage conv1 activation in VMEM (bf16, zero spatial halo) ----
        a2_ref[...] = jnp.zeros_like(a2_ref)
        a2_ref[1:1 + ho, 1:1 + wo, :] = (
            y.reshape(ho, wo, cout_p).astype(a2_ref.dtype))

        # ---- conv2 (3x3, stride 1) over the VMEM-resident activation ----
        acc2 = jnp.zeros((m, cout_p), jnp.float32)
        for dy in range(3):
            for dx in range(3):
                tap = a2_ref[dy:dy + ho, dx:dx + wo, :]
                acc2 = acc2 + jnp.dot(tap.reshape(m, cout_p),
                                      w2_ref[dy * 3 + dx],
                                      preferred_element_type=jnp.float32)

        # ---- residual ----
        if equal_in_out:
            # identity residual: plain f32 VPU add (no identity matmul)
            out = acc2 + r_ref[...].reshape(m, cout_p)
        else:
            # 1x1 shortcut conv fused as one bf16 MXU matmul
            out = acc2 + jnp.dot(r_ref[...].reshape(m, r_ref.shape[-1]),
                                 wsc_ref[...],
                                 preferred_element_type=jnp.float32)

        o_ref[...] = out.reshape(ho, wo, cout_p).astype(o_ref.dtype)

    return kernel


# ----------------------------------------------------------------- wrapper ---

def _fused_block_pallas(phases, res, w1, w2, s2, b2, wsc, *,
                        stride, ho, wo, equal_in_out, out_dtype):
    n = phases.shape[0]
    n_ph, hp, wp, cin_p = phases.shape[1:]
    cout_p = w1.shape[-1]
    cres_p = res.shape[-1]

    kern = _make_block_kernel(stride, ho, wo, equal_in_out)

    in_specs = [
        pl.BlockSpec((None, n_ph, hp, wp, cin_p), lambda b: (b, 0, 0, 0, 0)),
        pl.BlockSpec((None, ho, wo, cres_p), lambda b: (b, 0, 0, 0)),
        pl.BlockSpec((9, cin_p, cout_p), lambda b: (0, 0, 0)),
        pl.BlockSpec((9, cout_p, cout_p), lambda b: (0, 0, 0)),
        pl.BlockSpec((1, cout_p), lambda b: (0, 0)),
        pl.BlockSpec((1, cout_p), lambda b: (0, 0)),
    ]
    args = [phases, res, w1, w2, s2, b2]
    if not equal_in_out:
        in_specs.append(pl.BlockSpec((cin_p, cout_p), lambda b: (0, 0)))
        args.append(wsc)

    gs = pltpu.PrefetchScalarGridSpec(
        num_scalar_prefetch=0,
        grid=(n,),
        in_specs=in_specs,
        out_specs=pl.BlockSpec((None, ho, wo, cout_p), lambda b: (b, 0, 0, 0)),
        scratch_shapes=[pltpu.VMEM((ho + 2, wo + 2, cout_p), jnp.bfloat16)],
    )
    return pl.pallas_call(
        kern,
        out_shape=jax.ShapeDtypeStruct((n, ho, wo, cout_p), out_dtype),
        grid_spec=gs,
        compiler_params=pltpu.CompilerParams(dimension_semantics=("parallel",)),
    )(*args)


# --------------------------------------------------------------------- glue --

def _fold_bn(bn, eps=1e-5):
    scale = bn["gamma"] / jnp.sqrt(bn["var"] + eps)
    bias = bn["beta"] - bn["mean"] * scale
    return scale, bias


def _leaky(t):
    return jnp.where(t >= 0, t, 0.1 * t)


def basic_block_forward(x_nchw, params, *, stride, equal_in_out,
                        activate_before_residual, drop_rate=0.0):
    x = jnp.transpose(x_nchw, (0, 2, 3, 1)).astype(jnp.float32)   # NHWC
    n, h, w, cin = x.shape
    cout = int(params["conv1_w"].shape[0])
    cin_p = _round_up(cin, 128)
    cout_p = _round_up(cout, 128)
    ho = (h - 1) // stride + 1
    wo = (w - 1) // stride + 1

    s1, b1 = _fold_bn(params["bn1"])
    s2, b2 = _fold_bn(params["bn2"])

    # BN1 + LeakyReLU pre-activation (f32, XLA-fused into the pad / phase split).
    pre = _leaky(x * s1 + b1)

    if (not equal_in_out) and activate_before_residual:
        conv1_in, res_src = pre, pre
    elif equal_in_out:
        conv1_in, res_src = pre, x
    else:
        # PyTorch computes relu1(bn1(x)) here too, but conv1 and the shortcut
        # both consume the original x, so the activation is dead -> skipped.
        conv1_in, res_src = x, x

    # conv1 input: cast to bf16 *before* any expansion, zero spatial halo,
    # lane-pad channels, and (for stride=2) phase-split so every 3x3 tap is a
    # contiguous VMEM slice inside the kernel.
    xi = jnp.pad(conv1_in.astype(jnp.bfloat16),
                 ((0, 0), (1, 1), (1, 1), (0, cin_p - cin)))
    if stride == 1:
        phases = xi[:, None]                               # (n, 1, h+2, w+2, cin_p)
    else:
        phs = []
        for py in range(stride):
            for px in range(stride):
                p = xi[:, py::stride, px::stride, :][:, :ho + 1, :wo + 1, :]
                p = jnp.pad(p, ((0, 0), (0, ho + 1 - p.shape[1]),
                                (0, wo + 1 - p.shape[2]), (0, 0)))
                phs.append(p)
        phases = jnp.stack(phs, axis=1)                     # (n, 4, ho+1, wo+1, cin_p)

    # conv weights as per-tap matrices  [ky*3+kx, Cin_p, Cout_p]  (bf16)
    w1 = jnp.pad(jnp.transpose(params["conv1_w"], (2, 3, 1, 0)).reshape(9, cin, cout),
                 ((0, 0), (0, cin_p - cin), (0, cout_p - cout))).astype(jnp.bfloat16)
    w2 = jnp.pad(jnp.transpose(params["conv2_w"], (2, 3, 1, 0)).reshape(9, cout, cout),
                 ((0, 0), (0, cout_p - cout), (0, cout_p - cout))).astype(jnp.bfloat16)
    s2p = jnp.pad(s2, (0, cout_p - cout),
                  constant_values=1.0).reshape(1, cout_p).astype(jnp.float32)
    b2p = jnp.pad(b2, (0, cout_p - cout)).reshape(1, cout_p).astype(jnp.float32)

    if equal_in_out:
        # identity residual (PyTorch requires stride==1 here; ::stride is a no-op
        # then and only guards against ill-posed configs).
        res = jnp.pad(res_src[:, ::stride, ::stride, :],
                      ((0, 0), (0, 0), (0, 0),
                       (0, cout_p - cout))).astype(jnp.float32)
        wsc = None
    else:
        # 1x1 shortcut conv: strided residual rows + weight, both bf16 MXU operands
        res = jnp.pad(res_src[:, ::stride, ::stride, :],
                      ((0, 0), (0, 0), (0, 0),
                       (0, cin_p - cin))).astype(jnp.bfloat16)
        wsc = jnp.pad(params["conv_sc_w"][:, :, 0, 0].T,
                      ((0, cin_p - cin), (0, cout_p - cout))).astype(jnp.bfloat16)

    y = _fused_block_pallas(phases, res, w1, w2, s2p, b2p, wsc,
                            stride=stride, ho=ho, wo=wo,
                            equal_in_out=equal_in_out, out_dtype=jnp.float32)
    y = y[..., :cout]                                        # strip lane padding
    return jnp.transpose(y, (0, 3, 1, 2))                    # back to NCHW


# ----------------------------------------------------------- reference (JAX) --

def _ref_conv(x_nhwc, w_torch, stride):
    w = jnp.transpose(w_torch, (2, 3, 1, 0))  # HWIO
    pad = ((1, 1), (1, 1)) if w.shape[0] == 3 else ((0, 0), (0, 0))
    return jax.lax.conv_general_dilated(
        x_nhwc, w, window_strides=(stride, stride), padding=pad,
        dimension_numbers=("NHWC", "HWIO", "NHWC"))


def ref_block(x_nchw, params, stride, equal_in_out, abr):
    x = jnp.transpose(x_nchw, (0, 2, 3, 1)).astype(jnp.float32)
    s1, b1 = _fold_bn(params["bn1"])
    s2, b2 = _fold_bn(params["bn2"])
    leaky = lambda t: jnp.where(t >= 0, t, 0.1 * t)
    if (not equal_in_out) and abr:
        x = leaky(x * s1 + b1); c1in = x; res_src = x
    elif equal_in_out:
        c1in = leaky(x * s1 + b1); res_src = x
    else:
        c1in = x; res_src = x
    out = leaky(_ref_conv(c1in, params["conv1_w"], stride) * s2 + b2)
    out = _ref_conv(out, params["conv2_w"], 1)
    res = res_src if equal_in_out else _ref_conv(res_src, params["conv_sc_w"], stride)
    return jnp.transpose(res + out, (0, 3, 1, 2))


# --------------------------------------------------------------------- init --

def init_params(key, cin, cout, equal_in_out):
    ks = jax.random.split(key, 8)

    def bn_params(k, c):
        k1, k2, k3, k4 = jax.random.split(k, 4)
        return dict(gamma=(1.0 + 0.1 * jax.random.normal(k1, (c,))).astype(jnp.float32),
                    beta=(0.1 * jax.random.normal(k2, (c,))).astype(jnp.float32),
                    mean=(0.1 * jax.random.normal(k3, (c,))).astype(jnp.float32),
                    var=(jnp.abs(jax.random.normal(k4, (c,))) + 0.5).astype(jnp.float32))

    p = dict(bn1=bn_params(ks[0], cin), bn2=bn_params(ks[1], cout))
    p["conv1_w"] = (jax.random.normal(ks[2], (cout, cin, 3, 3)) /
                    math.sqrt(9 * cin)).astype(jnp.float32)
    p["conv2_w"] = (jax.random.normal(ks[3], (cout, cout, 3, 3)) /
                    math.sqrt(9 * cout)).astype(jnp.float32)
    if not equal_in_out:
        p["conv_sc_w"] = (jax.random.normal(ks[4], (cout, cin, 1, 1)) /
                          math.sqrt(cin)).astype(jnp.float32)
    return p


# --------------------------------------------------------------------- main --

if __name__ == "__main__":
    key = jax.random.PRNGKey(0)
    kx1, kx2, kp1, kp2 = jax.random.split(key, 4)

    fwd = jax.jit(basic_block_forward,
                  static_argnames=("stride", "equal_in_out",
                                   "activate_before_residual", "drop_rate"))

    # bf16 MXU operands -> tolerance reflects ~2^-8 input rounding through two convs.
    ATOL = RTOL = 3e-2

    # Config A: in_planes=4 -> out_planes=8, stride=2, activate_before_residual=True
    x_a = jax.random.normal(kx1, (2, 4, 16, 16), jnp.float32)
    params_a = init_params(kp1, 4, 8, equal_in_out=False)
    y_a = fwd(x_a, params_a, stride=2, equal_in_out=False,
              activate_before_residual=True)
    jax.block_until_ready(y_a)
    ref_a = ref_block(x_a, params_a, 2, False, True)
    np.testing.assert_allclose(np.asarray(y_a), np.asarray(ref_a),
                               atol=ATOL, rtol=RTOL)

    # Config B: in_planes = out_planes = 8, stride=1 (identity residual)
    x_b = jax.random.normal(kx2, (2, 8, 16, 16), jnp.float32)
    params_b = init_params(kp2, 8, 8, equal_in_out=True)
    y_b = fwd(x_b, params_b, stride=1, equal_in_out=True,
              activate_before_residual=False)
    jax.block_until_ready(y_b)
    ref_b = ref_block(x_b, params_b, 1, True, False)
    np.testing.assert_allclose(np.asarray(y_b), np.asarray(ref_b),
                               atol=ATOL, rtol=RTOL)

    print("KERNEL_OK")
</pallas_src>

<mosaic_0001>
module attributes {stable_mosaic.version = 11 : i64} {
  func.func @kernel(%arg0: i32, %arg1: memref<1x4x9x9x128xbf16, #tpu.memory_space<vmem>>, %arg2: memref<1x8x8x128xbf16, #tpu.memory_space<vmem>>, %arg3: memref<9x128x128xbf16, #tpu.memory_space<vmem>>, %arg4: memref<9x128x128xbf16, #tpu.memory_space<vmem>>, %arg5: memref<1x128xf32, #tpu.memory_space<vmem>>, %arg6: memref<1x128xf32, #tpu.memory_space<vmem>>, %arg7: memref<128x128xbf16, #tpu.memory_space<vmem>>, %arg8: memref<1x8x8x128xf32, #tpu.memory_space<vmem>>, %arg9: memref<10x10x128xbf16, #tpu.memory_space<vmem>>) attributes {dimension_semantics = [#tpu.dimension_semantics<parallel>], iteration_bounds = array<i64: 2>, scalar_prefetch = 0 : i64, scratch_operands = 1 : i64, tpu.core_type = #tpu.core_type<tc>, window_params = [{transform_indices = @transform_0, window_bounds = array<i64: 1, 4, 9, 9, 128>}, {transform_indices = @transform_1, window_bounds = array<i64: 1, 8, 8, 128>}, {pipeline_mode = #tpu.pipeline_mode<synchronous>, transform_indices = @transform_2, window_bounds = array<i64: 9, 128, 128>}, {pipeline_mode = #tpu.pipeline_mode<synchronous>, transform_indices = @transform_3, window_bounds = array<i64: 9, 128, 128>}, {pipeline_mode = #tpu.pipeline_mode<synchronous>, transform_indices = @transform_4, window_bounds = array<i64: 1, 128>}, {pipeline_mode = #tpu.pipeline_mode<synchronous>, transform_indices = @transform_5, window_bounds = array<i64: 1, 128>}, {pipeline_mode = #tpu.pipeline_mode<synchronous>, transform_indices = @transform_6, window_bounds = array<i64: 128, 128>}, {transform_indices = @transform_7, window_bounds = array<i64: 1, 8, 8, 128>}]} {
    %cst = arith.constant 0.000000e+00 : f32
    %0 = vector.broadcast %cst : f32 to vector<64x128xf32>
    %c0 = arith.constant 0 : index
    %c0_0 = arith.constant 0 : index
    %c0_1 = arith.constant 0 : index
    %c0_2 = arith.constant 0 : index
    %c0_3 = arith.constant 0 : index
    %1 = vector.load %arg1[%c0, %c0_0, %c0_1, %c0_2, %c0_3] : memref<1x4x9x9x128xbf16, #tpu.memory_space<vmem>>, vector<1x1x8x8x128xbf16>
    %2 = vector.shape_cast %1 : vector<1x1x8x8x128xbf16> to vector<8x8x128xbf16>
    %3 = vector.shape_cast %2 : vector<8x8x128xbf16> to vector<64x128xbf16>
    %c0_4 = arith.constant 0 : index
    %c0_5 = arith.constant 0 : index
    %c0_6 = arith.constant 0 : index
    %4 = vector.load %arg3[%c0_4, %c0_5, %c0_6] : memref<9x128x128xbf16, #tpu.memory_space<vmem>>, vector<1x128x128xbf16>
    %5 = vector.shape_cast %4 : vector<1x128x128xbf16> to vector<128x128xbf16>
    %cst_7 = arith.constant dense<0.000000e+00> : vector<64x128xf32>
    %6 = tpu.matmul %3, %5, %cst_7 {dimension_numbers = #tpu.dot_dimension_numbers<[1], [0], [0], [1], [0, 0, 1, 1], [], []>} : vector<64x128xbf16>, vector<128x128xbf16>, vector<64x128xf32> -> vector<64x128xf32>
    %7 = arith.addf %0, %6 : vector<64x128xf32>
    %c0_8 = arith.constant 0 : index
    %c1 = arith.constant 1 : index
    %c0_9 = arith.constant 0 : index
    %c0_10 = arith.constant 0 : index
    %c0_11 = arith.constant 0 : index
    %8 = vector.load %arg1[%c0_8, %c1, %c0_9, %c0_10, %c0_11] : memref<1x4x9x9x128xbf16, #tpu.memory_space<vmem>>, vector<1x1x8x8x128xbf16>
    %9 = vector.shape_cast %8 : vector<1x1x8x8x128xbf16> to vector<8x8x128xbf16>
    %10 = vector.shape_cast %9 : vector<8x8x128xbf16> to vector<64x128xbf16>
    %c1_12 = arith.constant 1 : index
    %c0_13 = arith.constant 0 : index
    %c0_14 = arith.constant 0 : index
    %11 = vector.load %arg3[%c1_12, %c0_13, %c0_14] : memref<9x128x128xbf16, #tpu.memory_space<vmem>>, vector<1x128x128xbf16>
    %12 = vector.shape_cast %11 : vector<1x128x128xbf16> to vector<128x128xbf16>
    %cst_15 = arith.constant dense<0.000000e+00> : vector<64x128xf32>
    %13 = tpu.matmul %10, %12, %cst_15 {dimension_numbers = #tpu.dot_dimension_numbers<[1], [0], [0], [1], [0, 0, 1, 1], [], []>} : vector<64x128xbf16>, vector<128x128xbf16>, vector<64x128xf32> -> vector<64x128xf32>
    %14 = arith.addf %7, %13 : vector<64x128xf32>
    %c0_16 = arith.constant 0 : index
    %c0_17 = arith.constant 0 : index
    %c0_18 = arith.constant 0 : index
    %c1_19 = arith.constant 1 : index
    %c0_20 = arith.constant 0 : index
    %15 = vector.load %arg1[%c0_16, %c0_17, %c0_18, %c1_19, %c0_20] : memref<1x4x9x9x128xbf16, #tpu.memory_space<vmem>>, vector<1x1x8x8x128xbf16>
    %16 = vector.shape_cast %15 : vector<1x1x8x8x128xbf16> to vector<8x8x128xbf16>
    %17 = vector.shape_cast %16 : vector<8x8x128xbf16> to vector<64x128xbf16>
    %c2 = arith.constant 2 : index
    %c0_21 = arith.constant 0 : index
    %c0_22 = arith.constant 0 : index
    %18 = vector.load %arg3[%c2, %c0_21, %c0_22] : memref<9x128x128xbf16, #tpu.memory_space<vmem>>, vector<1x128x128xbf16>
    %19 = vector.shape_cast %18 : vector<1x128x128xbf16> to vector<128x128xbf16>
    %cst_23 = arith.constant dense<0.000000e+00> : vector<64x128xf32>
    %20 = tpu.matmul %17, %19, %cst_23 {dimension_numbers = #tpu.dot_dimension_numbers<[1], [0], [0], [1], [0, 0, 1, 1], [], []>} : vector<64x128xbf16>, vector<128x128xbf16>, vector<64x128xf32> -> vector<64x128xf32>
    %21 = arith.addf %14, %20 : vector<64x128xf32>
    %c0_24 = arith.constant 0 : index
    %c2_25 = arith.constant 2 : index
    %c0_26 = arith.constant 0 : index
    %c0_27 = arith.constant 0 : index
    %c0_28 = arith.constant 0 : index
    %22 = vector.load %arg1[%c0_24, %c2_25, %c0_26, %c0_27, %c0_28] : memref<1x4x9x9x128xbf16, #tpu.memory_space<vmem>>, vector<1x1x8x8x128xbf16>
    %23 = vector.shape_cast %22 : vector<1x1x8x8x128xbf16> to vector<8x8x128xbf16>
    %24 = vector.shape_cast %23 : vector<8x8x128xbf16> to vector<64x128xbf16>
    %c3 = arith.constant 3 : index
    %c0_29 = arith.constant 0 : index
    %c0_30 = arith.constant 0 : index
    %25 = vector.load %arg3[%c3, %c0_29, %c0_30] : memref<9x128x128xbf16, #tpu.memory_space<vmem>>, vector<1x128x128xbf16>
    %26 = vector.shape_cast %25 : vector<1x128x128xbf16> to vector<128x128xbf16>
    %cst_31 = arith.constant dense<0.000000e+00> : vector<64x128xf32>
    %27 = tpu.matmul %24, %26, %cst_31 {dimension_numbers = #tpu.dot_dimension_numbers<[1], [0], [0], [1], [0, 0, 1, 1], [], []>} : vector<64x128xbf16>, vector<128x128xbf16>, vector<64x128xf32> -> vector<64x128xf32>
    %28 = arith.addf %21, %27 : vector<64x128xf32>
    %c0_32 = arith.constant 0 : index
    %c3_33 = arith.constant 3 : index
    %c0_34 = arith.constant 0 : index
    %c0_35 = arith.constant 0 : index
    %c0_36 = arith.constant 0 : index
    %29 = vector.load %arg1[%c0_32, %c3_33, %c0_34, %c0_35, %c0_36] : memref<1x4x9x9x128xbf16, #tpu.memory_space<vmem>>, vector<1x1x8x8x128xbf16>
    %30 = vector.shape_cast %29 : vector<1x1x8x8x128xbf16> to vector<8x8x128xbf16>
    %31 = vector.shape_cast %30 : vector<8x8x128xbf16> to vector<64x128xbf16>
    %c4 = arith.constant 4 : index
    %c0_37 = arith.constant 0 : index
    %c0_38 = arith.constant 0 : index
    %32 = vector.load %arg3[%c4, %c0_37, %c0_38] : memref<9x128x128xbf16, #tpu.memory_space<vmem>>, vector<1x128x128xbf16>
    %33 = vector.shape_cast %32 : vector<1x128x128xbf16> to vector<128x128xbf16>
    %cst_39 = arith.constant dense<0.000000e+00> : vector<64x128xf32>
    %34 = tpu.matmul %31, %33, %cst_39 {dimension_numbers = #tpu.dot_dimension_numbers<[1], [0], [0], [1], [0, 0, 1, 1], [], []>} : vector<64x128xbf16>, vector<128x128xbf16>, vector<64x128xf32> -> vector<64x128xf32>
    %35 = arith.addf %28, %34 : vector<64x128xf32>
    %c0_40 = arith.constant 0 : index
    %c2_41 = arith.constant 2 : index
    %c0_42 = arith.constant 0 : index
    %c1_43 = arith.constant 1 : index
    %c0_44 = arith.constant 0 : index
    %36 = vector.load %arg1[%c0_40, %c2_41, %c0_42, %c1_43, %c0_44] : memref<1x4x9x9x128xbf16, #tpu.memory_space<vmem>>, vector<1x1x8x8x128xbf16>
    %37 = vector.shape_cast %36 : vector<1x1x8x8x128xbf16> to vector<8x8x128xbf16>
    %38 = vector.shape_cast %37 : vector<8x8x128xbf16> to vector<64x128xbf16>
    %c5 = arith.constant 5 : index
    %c0_45 = arith.constant 0 : index
    %c0_46 = arith.constant 0 : index
    %39 = vector.load %arg3[%c5, %c0_45, %c0_46] : memref<9x128x128xbf16, #tpu.memory_space<vmem>>, vector<1x128x128xbf16>
    %40 = vector.shape_cast %39 : vector<1x128x128xbf16> to vector<128x128xbf16>
    %cst_47 = arith.constant dense<0.000000e+00> : vector<64x128xf32>
    %41 = tpu.matmul %38, %40, %cst_47 {dimension_numbers = #tpu.dot_dimension_numbers<[1], [0], [0], [1], [0, 0, 1, 1], [], []>} : vector<64x128xbf16>, vector<128x128xbf16>, vector<64x128xf32> -> vector<64x128xf32>
    %42 = arith.addf %35, %41 : vector<64x128xf32>
    %c0_48 = arith.constant 0 : index
    %c0_49 = arith.constant 0 : index
    %c1_50 = arith.constant 1 : index
    %c0_51 = arith.constant 0 : index
    %c0_52 = arith.constant 0 : index
    %43 = vector.load %arg1[%c0_48, %c0_49, %c1_50, %c0_51, %c0_52] : memref<1x4x9x9x128xbf16, #tpu.memory_space<vmem>>, vector<1x1x8x8x128xbf16>
    %44 = vector.shape_cast %43 : vector<1x1x8x8x128xbf16> to vector<8x8x128xbf16>
    %45 = vector.shape_cast %44 : vector<8x8x128xbf16> to vector<64x128xbf16>
    %c6 = arith.constant 6 : index
    %c0_53 = arith.constant 0 : index
    %c0_54 = arith.constant 0 : index
    %46 = vector.load %arg3[%c6, %c0_53, %c0_54] : memref<9x128x128xbf16, #tpu.memory_space<vmem>>, vector<1x128x128xbf16>
    %47 = vector.shape_cast %46 : vector<1x128x128xbf16> to vector<128x128xbf16>
    %cst_55 = arith.constant dense<0.000000e+00> : vector<64x128xf32>
    %48 = tpu.matmul %45, %47, %cst_55 {dimension_numbers = #tpu.dot_dimension_numbers<[1], [0], [0], [1], [0, 0, 1, 1], [], []>} : vector<64x128xbf16>, vector<128x128xbf16>, vector<64x128xf32> -> vector<64x128xf32>
    %49 = arith.addf %42, %48 : vector<64x128xf32>
    %c0_56 = arith.constant 0 : index
    %c1_57 = arith.constant 1 : index
    %c1_58 = arith.constant 1 : index
    %c0_59 = arith.constant 0 : index
    %c0_60 = arith.constant 0 : index
    %50 = vector.load %arg1[%c0_56, %c1_57, %c1_58, %c0_59, %c0_60] : memref<1x4x9x9x128xbf16, #tpu.memory_space<vmem>>, vector<1x1x8x8x128xbf16>
    %51 = vector.shape_cast %50 : vector<1x1x8x8x128xbf16> to vector<8x8x128xbf16>
    %52 = vector.shape_cast %51 : vector<8x8x128xbf16> to vector<64x128xbf16>
    %c7 = arith.constant 7 : index
    %c0_61 = arith.constant 0 : index
    %c0_62 = arith.constant 0 : index
    %53 = vector.load %arg3[%c7, %c0_61, %c0_62] : memref<9x128x128xbf16, #tpu.memory_space<vmem>>, vector<1x128x128xbf16>
    %54 = vector.shape_cast %53 : vector<1x128x128xbf16> to vector<128x128xbf16>
    %cst_63 = arith.constant dense<0.000000e+00> : vector<64x128xf32>
    %55 = tpu.matmul %52, %54, %cst_63 {dimension_numbers = #tpu.dot_dimension_numbers<[1], [0], [0], [1], [0, 0, 1, 1], [], []>} : vector<64x128xbf16>, vector<128x128xbf16>, vector<64x128xf32> -> vector<64x128xf32>
    %56 = arith.addf %49, %55 : vector<64x128xf32>
    %c0_64 = arith.constant 0 : index
    %c0_65 = arith.constant 0 : index
    %c1_66 = arith.constant 1 : index
    %c1_67 = arith.constant 1 : index
    %c0_68 = arith.constant 0 : index
    %57 = vector.load %arg1[%c0_64, %c0_65, %c1_66, %c1_67, %c0_68] : memref<1x4x9x9x128xbf16, #tpu.memory_space<vmem>>, vector<1x1x8x8x128xbf16>
    %58 = vector.shape_cast %57 : vector<1x1x8x8x128xbf16> to vector<8x8x128xbf16>
    %59 = vector.shape_cast %58 : vector<8x8x128xbf16> to vector<64x128xbf16>
    %c8 = arith.constant 8 : index
    %c0_69 = arith.constant 0 : index
    %c0_70 = arith.constant 0 : index
    %60 = vector.load %arg3[%c8, %c0_69, %c0_70] : memref<9x128x128xbf16, #tpu.memory_space<vmem>>, vector<1x128x128xbf16>
    %61 = vector.shape_cast %60 : vector<1x128x128xbf16> to vector<128x128xbf16>
    %cst_71 = arith.constant dense<0.000000e+00> : vector<64x128xf32>
    %62 = tpu.matmul %59, %61, %cst_71 {dimension_numbers = #tpu.dot_dimension_numbers<[1], [0], [0], [1], [0, 0, 1, 1], [], []>} : vector<64x128xbf16>, vector<128x128xbf16>, vector<64x128xf32> -> vector<64x128xf32>
    %63 = arith.addf %56, %62 : vector<64x128xf32>
    %c0_72 = arith.constant 0 : index
    %c0_73 = arith.constant 0 : index
    %64 = vector.load %arg5[%c0_72, %c0_73] : memref<1x128xf32, #tpu.memory_space<vmem>>, vector<1x128xf32>
    %65 = vector.broadcast %64 : vector<1x128xf32> to vector<64x128xf32>
    %66 = arith.mulf %63, %65 : vector<64x128xf32>
    %c0_74 = arith.constant 0 : index
    %c0_75 = arith.constant 0 : index
    %67 = vector.load %arg6[%c0_74, %c0_75] : memref<1x128xf32, #tpu.memory_space<vmem>>, vector<1x128xf32>
    %68 = vector.broadcast %67 : vector<1x128xf32> to vector<64x128xf32>
    %69 = arith.addf %66, %68 : vector<64x128xf32>
    %cst_76 = arith.constant 0.000000e+00 : f32
    %70 = vector.broadcast %cst_76 : f32 to vector<64x128xf32>
    %71 = arith.cmpf oge, %69, %70 : vector<64x128xf32>
    %cst_77 = arith.constant 1.000000e-01 : f32
    %72 = vector.broadcast %cst_77 : f32 to vector<64x128xf32>
    %73 = arith.mulf %72, %69 : vector<64x128xf32>
    %74 = arith.select %71, %69, %73 : vector<64x128xi1>, vector<64x128xf32>
    %cst_78 = arith.constant 0.000000e+00 : bf16
    %75 = vector.broadcast %cst_78 : bf16 to vector<10x10x128xbf16>
    %c0_79 = arith.constant 0 : index
    %c0_80 = arith.constant 0 : index
    %c0_81 = arith.constant 0 : index
    %76 = vector.load %arg9[%c0_79, %c0_80, %c0_81] : memref<10x10x128xbf16, #tpu.memory_space<vmem>>, vector<10x10x128xbf16>
    tpu.vector_store %arg9[%c0_79, %c0_80, %c0_81], %75 {strides = array<i32>} : memref<10x10x128xbf16, #tpu.memory_space<vmem>>, vector<10x10x128xbf16>,
    %77 = vector.shape_cast %74 : vector<64x128xf32> to vector<8x8x128xf32>
    %78 = arith.truncf %77 : vector<8x8x128xf32> to vector<8x8x128xbf16>
    %c1_82 = arith.constant 1 : index
    %c1_83 = arith.constant 1 : index
    %c0_84 = arith.constant 0 : index
    %79 = vector.load %arg9[%c1_82, %c1_83, %c0_84] : memref<10x10x128xbf16, #tpu.memory_space<vmem>>, vector<8x8x128xbf16>
    tpu.vector_store %arg9[%c1_82, %c1_83, %c0_84], %78 {strides = array<i32>} : memref<10x10x128xbf16, #tpu.memory_space<vmem>>, vector<8x8x128xbf16>,
    %cst_85 = arith.constant 0.000000e+00 : f32
    %80 = vector.broadcast %cst_85 : f32 to vector<64x128xf32>
    %c0_86 = arith.constant 0 : index
    %c0_87 = arith.constant 0 : index
    %c0_88 = arith.constant 0 : index
    %81 = vector.load %arg9[%c0_86, %c0_87, %c0_88] : memref<10x10x128xbf16, #tpu.memory_space<vmem>>, vector<8x8x128xbf16>
    %82 = vector.shape_cast %81 : vector<8x8x128xbf16> to vector<64x128xbf16>
    %c0_89 = arith.constant 0 : index
    %c0_90 = arith.constant 0 : index
    %c0_91 = arith.constant 0 : index
    %83 = vector.load %arg4[%c0_89, %c0_90, %c0_91] : memref<9x128x128xbf16, #tpu.memory_space<vmem>>, vector<1x128x128xbf16>
    %84 = vector.shape_cast %83 : vector<1x128x128xbf16> to vector<128x128xbf16>
    %cst_92 = arith.constant dense<0.000000e+00> : vector<64x128xf32>
    %85 = tpu.matmul %82, %84, %cst_92 {dimension_numbers = #tpu.dot_dimension_numbers<[1], [0], [0], [1], [0, 0, 1, 1], [], []>} : vector<64x128xbf16>, vector<128x128xbf16>, vector<64x128xf32> -> vector<64x128xf32>
    %86 = arith.addf %80, %85 : vector<64x128xf32>
    %c0_93 = arith.constant 0 : index
    %c1_94 = arith.constant 1 : index
    %c0_95 = arith.constant 0 : index
    %87 = vector.load %arg9[%c0_93, %c1_94, %c0_95] : memref<10x10x128xbf16, #tpu.memory_space<vmem>>, vector<8x8x128xbf16>
    %88 = vector.shape_cast %87 : vector<8x8x128xbf16> to vector<64x128xbf16>
    %c1_96 = arith.constant 1 : index
    %c0_97 = arith.constant 0 : index
    %c0_98 = arith.constant 0 : index
    %89 = vector.load %arg4[%c1_96, %c0_97, %c0_98] : memref<9x128x128xbf16, #tpu.memory_space<vmem>>, vector<1x128x128xbf16>
    %90 = vector.shape_cast %89 : vector<1x128x128xbf16> to vector<128x128xbf16>
    %cst_99 = arith.constant dense<0.000000e+00> : vector<64x128xf32>
    %91 = tpu.matmul %88, %90, %cst_99 {dimension_numbers = #tpu.dot_dimension_numbers<[1], [0], [0], [1], [0, 0, 1, 1], [], []>} : vector<64x128xbf16>, vector<128x128xbf16>, vector<64x128xf32> -> vector<64x128xf32>
    %92 = arith.addf %86, %91 : vector<64x128xf32>
    %c0_100 = arith.constant 0 : index
    %c2_101 = arith.constant 2 : index
    %c0_102 = arith.constant 0 : index
    %93 = vector.load %arg9[%c0_100, %c2_101, %c0_102] : memref<10x10x128xbf16, #tpu.memory_space<vmem>>, vector<8x8x128xbf16>
    %94 = vector.shape_cast %93 : vector<8x8x128xbf16> to vector<64x128xbf16>
    %c2_103 = arith.constant 2 : index
    %c0_104 = arith.constant 0 : index
    %c0_105 = arith.constant 0 : index
    %95 = vector.load %arg4[%c2_103, %c0_104, %c0_105] : memref<9x128x128xbf16, #tpu.memory_space<vmem>>, vector<1x128x128xbf16>
    %96 = vector.shape_cast %95 : vector<1x128x128xbf16> to vector<128x128xbf16>
    %cst_106 = arith.constant dense<0.000000e+00> : vector<64x128xf32>
    %97 = tpu.matmul %94, %96, %cst_106 {dimension_numbers = #tpu.dot_dimension_numbers<[1], [0], [0], [1], [0, 0, 1, 1], [], []>} : vector<64x128xbf16>, vector<128x128xbf16>, vector<64x128xf32> -> vector<64x128xf32>
    %98 = arith.addf %92, %97 : vector<64x128xf32>
    %c1_107 = arith.constant 1 : index
    %c0_108 = arith.constant 0 : index
    %c0_109 = arith.constant 0 : index
    %99 = vector.load %arg9[%c1_107, %c0_108, %c0_109] : memref<10x10x128xbf16, #tpu.memory_space<vmem>>, vector<8x8x128xbf16>
    %100 = vector.shape_cast %99 : vector<8x8x128xbf16> to vector<64x128xbf16>
    %c3_110 = arith.constant 3 : index
    %c0_111 = arith.constant 0 : index
    %c0_112 = arith.constant 0 : index
    %101 = vector.load %arg4[%c3_110, %c0_111, %c0_112] : memref<9x128x128xbf16, #tpu.memory_space<vmem>>, vector<1x128x128xbf16>
    %102 = vector.shape_cast %101 : vector<1x128x128xbf16> to vector<128x128xbf16>
    %cst_113 = arith.constant dense<0.000000e+00> : vector<64x128xf32>
    %103 = tpu.matmul %100, %102, %cst_113 {dimension_numbers = #tpu.dot_dimension_numbers<[1], [0], [0], [1], [0, 0, 1, 1], [], []>} : vector<64x128xbf16>, vector<128x128xbf16>, vector<64x128xf32> -> vector<64x128xf32>
    %104 = arith.addf %98, %103 : vector<64x128xf32>
    %c1_114 = arith.constant 1 : index
    %c1_115 = arith.constant 1 : index
    %c0_116 = arith.constant 0 : index
    %105 = vector.load %arg9[%c1_114, %c1_115, %c0_116] : memref<10x10x128xbf16, #tpu.memory_space<vmem>>, vector<8x8x128xbf16>
    %106 = vector.shape_cast %105 : vector<8x8x128xbf16> to vector<64x128xbf16>
    %c4_117 = arith.constant 4 : index
    %c0_118 = arith.constant 0 : index
    %c0_119 = arith.constant 0 : index
    %107 = vector.load %arg4[%c4_117, %c0_118, %c0_119] : memref<9x128x128xbf16, #tpu.memory_space<vmem>>, vector<1x128x128xbf16>
    %108 = vector.shape_cast %107 : vector<1x128x128xbf16> to vector<128x128xbf16>
    %cst_120 = arith.constant dense<0.000000e+00> : vector<64x128xf32>
    %109 = tpu.matmul %106, %108, %cst_120 {dimension_numbers = #tpu.dot_dimension_numbers<[1], [0], [0], [1], [0, 0, 1, 1], [], []>} : vector<64x128xbf16>, vector<128x128xbf16>, vector<64x128xf32> -> vector<64x128xf32>
    %110 = arith.addf %104, %109 : vector<64x128xf32>
    %c1_121 = arith.constant 1 : index
    %c2_122 = arith.constant 2 : index
    %c0_123 = arith.constant 0 : index
    %111 = vector.load %arg9[%c1_121, %c2_122, %c0_123] : memref<10x10x128xbf16, #tpu.memory_space<vmem>>, vector<8x8x128xbf16>
    %112 = vector.shape_cast %111 : vector<8x8x128xbf16> to vector<64x128xbf16>
    %c5_124 = arith.constant 5 : index
    %c0_125 = arith.constant 0 : index
    %c0_126 = arith.constant 0 : index
    %113 = vector.load %arg4[%c5_124, %c0_125, %c0_126] : memref<9x128x128xbf16, #tpu.memory_space<vmem>>, vector<1x128x128xbf16>
    %114 = vector.shape_cast %113 : vector<1x128x128xbf16> to vector<128x128xbf16>
    %cst_127 = arith.constant dense<0.000000e+00> : vector<64x128xf32>
    %115 = tpu.matmul %112, %114, %cst_127 {dimension_numbers = #tpu.dot_dimension_numbers<[1], [0], [0], [1], [0, 0, 1, 1], [], []>} : vector<64x128xbf16>, vector<128x128xbf16>, vector<64x128xf32> -> vector<64x128xf32>
    %116 = arith.addf %110, %115 : vector<64x128xf32>
    %c2_128 = arith.constant 2 : index
    %c0_129 = arith.constant 0 : index
    %c0_130 = arith.constant 0 : index
    %117 = vector.load %arg9[%c2_128, %c0_129, %c0_130] : memref<10x10x128xbf16, #tpu.memory_space<vmem>>, vector<8x8x128xbf16>
    %118 = vector.shape_cast %117 : vector<8x8x128xbf16> to vector<64x128xbf16>
    %c6_131 = arith.constant 6 : index
    %c0_132 = arith.constant 0 : index
    %c0_133 = arith.constant 0 : index
    %119 = vector.load %arg4[%c6_131, %c0_132, %c0_133] : memref<9x128x128xbf16, #tpu.memory_space<vmem>>, vector<1x128x128xbf16>
    %120 = vector.shape_cast %119 : vector<1x128x128xbf16> to vector<128x128xbf16>
    %cst_134 = arith.constant dense<0.000000e+00> : vector<64x128xf32>
    %121 = tpu.matmul %118, %120, %cst_134 {dimension_numbers = #tpu.dot_dimension_numbers<[1], [0], [0], [1], [0, 0, 1, 1], [], []>} : vector<64x128xbf16>, vector<128x128xbf16>, vector<64x128xf32> -> vector<64x128xf32>
    %122 = arith.addf %116, %121 : vector<64x128xf32>
    %c2_135 = arith.constant 2 : index
    %c1_136 = arith.constant 1 : index
    %c0_137 = arith.constant 0 : index
    %123 = vector.load %arg9[%c2_135, %c1_136, %c0_137] : memref<10x10x128xbf16, #tpu.memory_space<vmem>>, vector<8x8x128xbf16>
    %124 = vector.shape_cast %123 : vector<8x8x128xbf16> to vector<64x128xbf16>
    %c7_138 = arith.constant 7 : index
    %c0_139 = arith.constant 0 : index
    %c0_140 = arith.constant 0 : index
    %125 = vector.load %arg4[%c7_138, %c0_139, %c0_140] : memref<9x128x128xbf16, #tpu.memory_space<vmem>>, vector<1x128x128xbf16>
    %126 = vector.shape_cast %125 : vector<1x128x128xbf16> to vector<128x128xbf16>
    %cst_141 = arith.constant dense<0.000000e+00> : vector<64x128xf32>
    %127 = tpu.matmul %124, %126, %cst_141 {dimension_numbers = #tpu.dot_dimension_numbers<[1], [0], [0], [1], [0, 0, 1, 1], [], []>} : vector<64x128xbf16>, vector<128x128xbf16>, vector<64x128xf32> -> vector<64x128xf32>
    %128 = arith.addf %122, %127 : vector<64x128xf32>
    %c2_142 = arith.constant 2 : index
    %c2_143 = arith.constant 2 : index
    %c0_144 = arith.constant 0 : index
    %129 = vector.load %arg9[%c2_142, %c2_143, %c0_144] : memref<10x10x128xbf16, #tpu.memory_space<vmem>>, vector<8x8x128xbf16>
    %130 = vector.shape_cast %129 : vector<8x8x128xbf16> to vector<64x128xbf16>
    %c8_145 = arith.constant 8 : index
    %c0_146 = arith.constant 0 : index
    %c0_147 = arith.constant 0 : index
    %131 = vector.load %arg4[%c8_145, %c0_146, %c0_147] : memref<9x128x128xbf16, #tpu.memory_space<vmem>>, vector<1x128x128xbf16>
    %132 = vector.shape_cast %131 : vector<1x128x128xbf16> to vector<128x128xbf16>
    %cst_148 = arith.constant dense<0.000000e+00> : vector<64x128xf32>
    %133 = tpu.matmul %130, %132, %cst_148 {dimension_numbers = #tpu.dot_dimension_numbers<[1], [0], [0], [1], [0, 0, 1, 1], [], []>} : vector<64x128xbf16>, vector<128x128xbf16>, vector<64x128xf32> -> vector<64x128xf32>
    %134 = arith.addf %128, %133 : vector<64x128xf32>
    %c0_149 = arith.constant 0 : index
    %c0_150 = arith.constant 0 : index
    %c0_151 = arith.constant 0 : index
    %c0_152 = arith.constant 0 : index
    %135 = vector.load %arg2[%c0_149, %c0_150, %c0_151, %c0_152] : memref<1x8x8x128xbf16, #tpu.memory_space<vmem>>, vector<1x8x8x128xbf16>
    %136 = vector.shape_cast %135 : vector<1x8x8x128xbf16> to vector<8x8x128xbf16>
    %137 = vector.shape_cast %136 : vector<8x8x128xbf16> to vector<64x128xbf16>
    %c0_153 = arith.constant 0 : index
    %c0_154 = arith.constant 0 : index
    %138 = vector.load %arg7[%c0_153, %c0_154] : memref<128x128xbf16, #tpu.memory_space<vmem>>, vector<128x128xbf16>
    %cst_155 = arith.constant dense<0.000000e+00> : vector<64x128xf32>
    %139 = tpu.matmul %137, %138, %cst_155 {dimension_numbers = #tpu.dot_dimension_numbers<[1], [0], [0], [1], [0, 0, 1, 1], [], []>} : vector<64x128xbf16>, vector<128x128xbf16>, vector<64x128xf32> -> vector<64x128xf32>
    %140 = arith.addf %134, %139 : vector<64x128xf32>
    %141 = vector.shape_cast %140 : vector<64x128xf32> to vector<8x8x128xf32>
    %c0_156 = arith.constant 0 : index
    %c0_157 = arith.constant 0 : index
    %c0_158 = arith.constant 0 : index
    %c0_159 = arith.constant 0 : index
    %142 = vector.load %arg8[%c0_156, %c0_157, %c0_158, %c0_159] : memref<1x8x8x128xf32, #tpu.memory_space<vmem>>, vector<1x8x8x128xf32>
    %143 = vector.shape_cast %142 : vector<1x8x8x128xf32> to vector<8x8x128xf32>
    %144 = vector.shape_cast %141 : vector<8x8x128xf32> to vector<1x8x8x128xf32>
    tpu.vector_store %arg8[%c0_156, %c0_157, %c0_158, %c0_159], %144 {strides = array<i32>} : memref<1x8x8x128xf32, #tpu.memory_space<vmem>>, vector<1x8x8x128xf32>,
    return
  }
  func.func @transform_0(%arg0: i32) -> (i32, i32, i32, i32, i32) {
    %c0_i32 = arith.constant 0 : i32
    %c0_i32_0 = arith.constant 0 : i32
    %c0_i32_1 = arith.constant 0 : i32
    %c0_i32_2 = arith.constant 0 : i32
    %c0_i32_3 = arith.constant 0 : i32
    return %arg0, %c0_i32, %c0_i32_0, %c0_i32_1, %c0_i32_2 : i32, i32, i32, i32, i32
  }
  func.func @transform_1(%arg0: i32) -> (i32, i32, i32, i32) {
    %c0_i32 = arith.constant 0 : i32
    %c0_i32_0 = arith.constant 0 : i32
    %c0_i32_1 = arith.constant 0 : i32
    %c0_i32_2 = arith.constant 0 : i32
    return %arg0, %c0_i32, %c0_i32_0, %c0_i32_1 : i32, i32, i32, i32
  }
  func.func @transform_2(%arg0: i32) -> (i32, i32, i32) {
    %c0_i32 = arith.constant 0 : i32
    %c0_i32_0 = arith.constant 0 : i32
    %c0_i32_1 = arith.constant 0 : i32
    %c0_i32_2 = arith.constant 0 : i32
    return %c0_i32, %c0_i32_0, %c0_i32_1 : i32, i32, i32
  }
  func.func @transform_3(%arg0: i32) -> (i32, i32, i32) {
    %c0_i32 = arith.constant 0 : i32
    %c0_i32_0 = arith.constant 0 : i32
    %c0_i32_1 = arith.constant 0 : i32
    %c0_i32_2 = arith.constant 0 : i32
    return %c0_i32, %c0_i32_0, %c0_i32_1 : i32, i32, i32
  }
  func.func @transform_4(%arg0: i32) -> (i32, i32) {
    %c0_i32 = arith.constant 0 : i32
    %c0_i32_0 = arith.constant 0 : i32
    %c0_i32_1 = arith.constant 0 : i32
    return %c0_i32, %c0_i32_0 : i32, i32
  }
  func.func @transform_5(%arg0: i32) -> (i32, i32) {
    %c0_i32 = arith.constant 0 : i32
    %c0_i32_0 = arith.constant 0 : i32
    %c0_i32_1 = arith.constant 0 : i32
    return %c0_i32, %c0_i32_0 : i32, i32
  }
  func.func @transform_6(%arg0: i32) -> (i32, i32) {
    %c0_i32 = arith.constant 0 : i32
    %c0_i32_0 = arith.constant 0 : i32
    %c0_i32_1 = arith.constant 0 : i32
    return %c0_i32, %c0_i32_0 : i32, i32
  }
  func.func @transform_7(%arg0: i32) -> (i32, i32, i32, i32) {
    %c0_i32 = arith.constant 0 : i32
    %c0_i32_0 = arith.constant 0 : i32
    %c0_i32_1 = arith.constant 0 : i32
    %c0_i32_2 = arith.constant 0 : i32
    return %arg0, %c0_i32, %c0_i32_0, %c0_i32_1 : i32, i32, i32, i32
  }
}

</mosaic_0001>

<bundles_post_ra>
// kernel: basic_block_forward.1
= control target key start
LH: loop header
LB: loop body
LE: loop exit
PB: predicated region body
PF: predicated region fallthrough
CT: control target
= control target key end

     0   :  { %s6306_s24 = smov 0   ;;  %s7325_s0 = inlined_call_operand.vmem [shape: bf16[2,4,9,9,128], index: 0, kind: input, shape index: {}]   ;;  %s7326_s1 = inlined_call_operand.vmem [shape: bf16[2,8,8,128], index: 1, kind: input, shape index: {}]   ;;  %s7327_s2 = inlined_call_operand.vmem [shape: bf16[9,128,128], index: 2, kind: input, shape index: {}]   ;;  %s7328_s3 = inlined_call_operand.vmem [shape: bf16[9,128,128], index: 3, kind: input, shape index: {}]   ;;  %s7329_s4 = inlined_call_operand.vmem [shape: f32[1,128], index: 4, kind: input, shape index: {}]   ;;  %s7330_s5 = inlined_call_operand.vmem [shape: f32[1,128], index: 5, kind: input, shape index: {}]   ;;  %s7331_s6 = inlined_call_operand.vmem [shape: bf16[128,128], index: 6, kind: input, shape index: {}]   ;;  %s7332_s7 = inlined_call_operand.vmem [shape: f32[2,8,8,128], index: 7, kind: output, shape index: {}]  }
   0x1 LB: > { %s4607_s25 = sadd.s32 4294967295, %s6263_s24   ;;  %p4611_p0 = scmp.ge.s32.totalorder %s6263_s24, 1  ;;  %s6263_s24 = sphi %s6306_s24, %s17_s24  }
   0x2   : > { %p247_p1 = scmp.lt.s32.totalorder %s6263_s24, 3 }
   0x4   : > { %p248_p2 = pnand %p4611_p0, %p247_p1 }
   0x5   : > { %v6065_v0 = vld [vmem:[%s7327_s2 + $0x40] sm:$0xff] (!%p248_p2)   ;;  %p284_p3 = scmp.lt.s32.totalorder (!%p248_p2), %s4607_s25, 1  ;;  %v6066_v1 = vld [vmem:[%s7327_s2 + $0x48] sm:$0xff] (!%p248_p2)   ;;  %v6067_v2 = vld [vmem:[%s7327_s2 + $0x50] sm:$0xff] (!%p248_p2)   ;;  %vm640_vm0 = vsmask.f32 (!%p248_p2), 3328 }
   0x6   : > { %251 = sbr.rel (%p248_p2) target bundleno = 1057 (0x421), region = 48  ;;  %5447 = vmatprep.subr.bf16.mxu0 (!%p248_p2), %v6065_v0  ;;  %v6068_v3 = vld [vmem:[%s7327_s2 + $0x58] sm:$0xff] (!%p248_p2)   ;;  %v6069_v5 = vld [vmem:[%s7327_s2 + $0x60] sm:$0xff] (!%p248_p2)   ;;  %v6070_v6 = vld [vmem:[%s7327_s2 + $0x68] sm:$0xff] (!%p248_p2)   ;;  %vm641_vm1 = vsmask.f32 (!%p248_p2), 7440 }
   0x7   : > { %5448 = vmatpush3.bf16.msra.mxu0 (!%p248_p2), %v6065_v0  ;;  %v6071_v7 = vld [vmem:[%s7327_s2 + $0x70] sm:$0xff] (!%p248_p2)   ;;  %v6072_v8 = vld [vmem:[%s7327_s2 + $0x78] sm:$0xff] (!%p248_p2)   ;;  %v6074_v9 = vld [vmem:[%s7327_s2] sm:$0xff] (!%p248_p2)   ;;  %vm2344_vm3 = vcmask (!%p248_p2), 1043456   ;;  %vm2345_vm4 = vsmask.f32 (!%p248_p2), 7938 }
   0x8   : > { %5449 = vmatprep.subr.bf16.mxu0 (!%p248_p2), %v6066_v1  ;;  %v6076_v12 = vld [vmem:[%s7327_s2 + $0x8] sm:$0xff] (!%p248_p2)   ;;  %v6077_v13 = vld [vmem:[%s7327_s2 + $0x10] sm:$0xff] (!%p248_p2)   ;;  %v6078_v16 = vld [vmem:[%s7327_s2 + $0x18] sm:$0xff] (!%p248_p2)   ;;  %vm2351_vm5 = vsmask.f32 (!%p248_p2), 256  ;;  %vm2350_vm7 = vcmask (!%p248_p2), 1040384  }
   0x9   : > { %v6079_v17 = vld [vmem:[%s7327_s2 + $0x20] sm:$0xff] (!%p248_p2)   ;;  %v6080_v18 = vld [vmem:[%s7327_s2 + $0x28] sm:$0xff] (!%p248_p2)   ;;  %v6082_v23 = vld [vmem:[%s7327_s2 + $0x30] sm:$0xff] (!%p248_p2)  }
   0xa   : > { %v6084_v27 = vld [vmem:[%s7327_s2 + $0x38] sm:$0xff] (!%p248_p2)   ;;  %v6086_v33 = vld [vmem:[%s7327_s2 + $0x80] sm:$0xff] (!%p248_p2)   ;;  %v6088_v40 = vld [vmem:[%s7327_s2 + $0x88] sm:$0xff] (!%p248_p2)  }
   0xb   : > { %5450 = vmatpush3.bf16.msra.mxu0 (!%p248_p2), %v6066_v1  ;;  %vm6389_vm2 = vmor (!%p248_p2), %vm640_vm0, %vm641_vm1  ;;  %v6089_v50 = vld [vmem:[%s7327_s2 + $0x90] sm:$0xff] (!%p248_p2)   ;;  %v6090_v54 = vld [vmem:[%s7327_s2 + $0x98] sm:$0xff] (!%p248_p2)   ;;  %vm2849_vm1 = vcmask (!%p248_p2), 1042432  }
   0xc   : > { %5451 = vmatprep.subr.bf16.mxu0 (!%p248_p2), %v6067_v2  ;;  %v6091_v0 = vld [vmem:[%s7327_s2 + $0xa0] sm:$0xff] (!%p248_p2)   ;;  %vm6728_vm11 = vmand (!%p248_p2), %vm2344_vm3, %vm2345_vm4  ;;  %vm2850_vm3 = vcmask (!%p248_p2), 1046532  }
   0xd   : > { %s7342_s25 = smov (!%p284_p3, %s4607_s25), 1  ;;  %vm6735_vm12 = vmand %vm2350_vm7, %vm2351_vm5  ;;  %v6245_v46 = vld [vmem:[%s7328_s3 + $0x220] sm:$0xff]  }
   0xe   : > { %s6055_s9 = smul.u32 288, %s7342_s25  ;;  %vm6860_vm4 = vmor %vm2849_vm1, %vm2850_vm3  ;;  %s5209_s30 = sshll.u32 %s7342_s25, 5 }
   0xf   : > { %5452 = vmatpush3.bf16.msra.mxu0 %v6067_v2  ;;  %s7114_s11 = scalar_lea.vmem %s7326_s1, %s5209_s30  ;;  %s5210_s13 = sshll.u32 %s7342_s25, 6 }
  0x10   : > { %s6329_s12 = scalar_lea.vmem %s7325_s0, %s6055_s9  ;;  %5453 = vmatprep.subr.bf16.mxu0 %v6068_v3  ;;  %s298_s16 = scalar_lea.vmem %s7332_s7, %s5210_s13 }
  0x11   : > { %v6073_v4 = vld [vmem:[%s6329_s12 + $0x48] ss:$8 sps:$4 sm:$0xff]   ;;  %v6075_v10 = vld [vmem:[%s6329_s12 + $0x58] ss:$8 sps:$4 sm:$0xff]   ;;  %v625_v26 = vld [vmem:[%s6329_s12 + $0x4] sm:$0x1] }
  0x12   : > { %5463 = vmatprep.mubr.bf16.mxu0 %v6073_v4  ;;  %v6081_v11 = vld [vmem:[%s6329_s12 + $0x68] ss:$8 sps:$4 sm:$0xff]   ;;  %v6083_v14 = vld [vmem:[%s6329_s12 + $0x78] ss:$8 sps:$4 sm:$0xff]   ;;  %v627_v28 = vld [vmem:[%s6329_s12 + $0xc] sm:$0x1] }
  0x13   : > { %5454 = vmatpush3.bf16.msra.mxu0 %v6068_v3  ;;  %v6085_v15 = vld [vmem:[%s6329_s12] ss:$8 sps:$4 sm:$0xff]   ;;  %v653_v34 = vshll.u32 %v625_v26, 16  ;;  %v667_v35 = vshll.u32 %v627_v28, 16  ;;  %v6087_v36 = vld [vmem:[%s6329_s12 + $0x10] ss:$8 sps:$4 sm:$0xff]  }
  0x14   : > { %5455 = vmatprep.subr.bf16.mxu0 %v6069_v5  ;;  %v624_v19 = vld [vmem:[%s6329_s12] sm:$0xf]  ;;  %v626_v20 = vld [vmem:[%s6329_s12 + $0x8] sm:$0xf]  ;;  %v628_v41 = vld [vmem:[%s6329_s12 + $0x10] sm:$0xf] }
  0x15   : > { %v644_v21 = vshrl.u32 %v624_v19, 16  ;;  %v647_v22 = vshll.u32 %v624_v19, 16  ;;  %v658_v24 = vshrl.u32 %v626_v20, 16  ;;  %v661_v25 = vshll.u32 %v626_v20, 16  ;;  %v6093_v39 = vld [vmem:[%s6329_s12 + $0x20] ss:$8 sps:$4 sm:$0xff]  }
  0x16   : > { %v655_v42 = vrot.slane %v653_v34, 5  ;;  %v669_v43 = vrot.slane %v667_v35, 5  ;;  %v630_v47 = vld [vmem:[%s6329_s12 + $0x18] sm:$0xf]  ;;  %v672_v48 = vshrl.u32 %v628_v41, 16  ;;  %v675_v49 = vshll.u32 %v628_v41, 16 }
  0x17   : > { %5456 = vmatpush3.bf16.msra.mxu0 %v6069_v5  ;;  %v646_v29 = vrot.slane %v644_v21, 4  ;;  %v649_v30 = vrot.slane %v647_v22, 5  ;;  %v660_v31 = vrot.slane %v658_v24, 4  ;;  %v663_v32 = vrot.slane %v661_v25, 5  ;;  %v6095_v53 = vld [vmem:[%s6329_s12 + $0x30] ss:$8 sps:$4 sm:$0xff]  }
  0x18   : > { %5457 = vmatprep.subr.bf16.mxu0 %v6070_v6  ;;  %v686_v55 = vshrl.u32 %v630_v47, 16  ;;  %v689_v56 = vshll.u32 %v630_v47, 16  ;;  %v674_v58 = vrot.slane %v672_v48, 4  ;;  %v677_v59 = vrot.slane %v675_v49, 5  ;;  %v632_v60 = vld [vmem:[%s6329_s12 + $0x20] sm:$0xf] }
  0x19   : > { %v650_v37 = vor.u32 %v649_v30, %v646_v29  ;;  %v664_v38 = vor.u32 %v663_v32, %v660_v31  ;;  %v629_v61 = vld [vmem:[%s6329_s12 + $0x14] sm:$0x1]  ;;  %v631_v62 = vld [vmem:[%s6329_s12 + $0x1c] sm:$0x1]  ;;  %v634_v63 = vld [vmem:[%s6329_s12 + $0x28] sm:$0xf] }
  0x1a   : > { %v688_v1 = vrot.slane %v686_v55, 4  ;;  %v691_v2 = vrot.slane %v689_v56, 5  ;;  %v700_v3 = vshrl.u32 %v632_v60, 16  ;;  %v703_v4 = vshll.u32 %v632_v60, 16  ;;  %v6094_v28 = vld [vmem:[%s7327_s2 + $0xb0] sm:$0xff]   ;;  %v6098_v60 = vld [vmem:[%s7327_s2 + $0xc8] sm:$0xff]  }
  0x1b   : > { %5458 = vmatpush3.bf16.msra.mxu0 %v6070_v6  ;;  %v651_v44 = vrot.slane %v650_v37, 4  ;;  %v665_v45 = vrot.slane %v664_v38, 4  ;;  %v714_v5 = vshrl.u32 %v634_v63, 16  ;;  %v717_v6 = vshll.u32 %v634_v63, 16  ;;  %v637_v35 = vld [vmem:[%s6329_s12 + $0x34] sm:$0x1] }
  0x1c   : > { %5459 = vmatprep.subr.bf16.mxu0 %v6071_v7  ;;  %v639_v37 = vld [vmem:[%s6329_s12 + $0x3c] sm:$0x1] }
  0x1d   : > { %v656_v51 = vsel %vm6389_vm2, %v651_v44, %v655_v42  ;;  %v670_v52 = vsel %vm6389_vm2, %v665_v45, %v669_v43  ;;  %v719_v19 = vrot.slane %v717_v6, 5  ;;  %v737_v45 = vshll.u32 %v637_v35, 16  ;;  %v6104_v6 = vld [vmem:[%s7327_s2 + $0xf8] sm:$0xff]  }
  0x1e   : > { %v4681_v57 = vcombine.low %v656_v51, %v670_v52  ;;  %v6097_v51 = vld [vmem:[%s7327_s2 + $0xc0] sm:$0xff]  }
  0x1f   : > { %5460 = vmatpush3.bf16.msra.mxu0 %v6071_v7  ;;  %v6092_v7 = vld [vmem:[%s7327_s2 + $0xa8] sm:$0xff]   ;;  %v739_v55 = vrot.slane %v737_v45, 5  ;;  %v6118_v45 = vld [vmem:[%s7327_s2 + $0x140] sm:$0xff]  }
  0x20   : > { %5461 = vmatprep.subr.bf16.mxu0 %v6072_v8 }
  0x23   : > { %5462 = vmatpush3.bf16.msra.mxu0 %v6072_v8  ;;  %v681_v8 = vshll.u32 %v629_v61, 16  ;;  %v6099_v61 = vld [vmem:[%s7327_s2 + $0xd0] sm:$0xff]  }
  0x24   : > { %5471 = vmatprep.subr.bf16.mxu0 %v6074_v9 }
  0x25   : > { %v683_v26 = vrot.slane %v681_v8, 5  ;;  %v6107_v8 = vld [vmem:[%s6329_s12 + $0xa0] ss:$8 sps:$4 sm:$0xff]  }
  0x26   : > { %5464 = vmatmul.mubr.bf16.vlgmr.msra.gmra.mrb[0].mxu0 %v6075_v10  ;;  %v633_v10 = vld [vmem:[%s6329_s12 + $0x24] sm:$0x1] }
  0x27   : > { %5472 = vmatpush3.bf16.msra.mxu0 %v6074_v9  ;;  %5467 = vmatprep.mubr.bf16.mxu0 %v6081_v11  ;;  %v695_v9 = vshll.u32 %v631_v62, 16  ;;  %v635_v11 = vld [vmem:[%s6329_s12 + $0x2c] sm:$0x1]  ;;  %v709_v20 = vshll.u32 %v633_v10, 16 }
  0x28   : > { %5473 = vmatprep.subr.bf16.mxu0 %v6076_v12  ;;  %v723_v21 = vshll.u32 %v635_v11, 16  ;;  %v6108_v10 = vld [vmem:[%s7327_s2 + $0x108] sm:$0xff]   ;;  %v6109_v11 = vld [vmem:[%s7327_s2 + $0x110] sm:$0xff]  }
  0x2a   : > { %v725_v34 = vrot.slane %v723_v21, 5  ;;  %v6114_v21 = vld [vmem:[%s7327_s2 + $0x130] sm:$0xff]  }
  0x2b   : > { %5474 = vmatpush3.bf16.msra.mxu0 %v6076_v12  ;;  %v678_v12 = vor.u32 %v677_v59, %v674_v58 }
  0x2c   : > { %5475 = vmatprep.subr.bf16.mxu0 %v6077_v13 }
  0x2d   : > { %v679_v29 = vrot.slane %v678_v12, 4  ;;  %v6115_v12 = vld [vmem:[%s6329_s12 + $0xc0] ss:$8 sps:$4 sm:$0xff]  }
  0x2e   : > { %5468 = vmatmul.mubr.bf16.gmra.mrb[4].mxu0 %v6083_v14  ;;  %v636_v14 = vld [vmem:[%s6329_s12 + $0x30] sm:$0xf] }
  0x2f   : > { %5476 = vmatpush3.bf16.msra.mxu0 %v6077_v13  ;;  %5487 = vmatprep.mubr.bf16.mxu0 %v6085_v15  ;;  %v692_v13 = vor.u32 %v691_v2, %v688_v1  ;;  %v638_v15 = vld [vmem:[%s6329_s12 + $0x38] sm:$0xf]  ;;  %v728_v22 = vshrl.u32 %v636_v14, 16  ;;  %v684_v44 = vsel %vm6389_vm2, %v679_v29, %v683_v26  ;;  %v4766_v26 = vld [vmem:[%s6329_s12 + $0x94] sm:$0x1] }
  0x30   : > { %5477 = vmatprep.subr.bf16.mxu0 %v6078_v16  ;;  %v742_v24 = vshrl.u32 %v638_v15, 16  ;;  %v745_v25 = vshll.u32 %v638_v15, 16  ;;  %v6105_v2 = vld [vmem:[%s6329_s12 + $0x90] ss:$8 sps:$4 sm:$0xff]   ;;  %v6111_v15 = vld [vmem:[%s7327_s2 + $0x120] sm:$0xff]   ;;  %v1277_v35 = vshll.u32 %v4766_v26, 16 }
  0x31   : > { %v693_v30 = vrot.slane %v692_v13, 4  ;;  %v730_v38 = vrot.slane %v728_v22, 4  ;;  %v6110_v13 = vld [vmem:[%s7327_s2 + $0x118] sm:$0xff]   ;;  %v4771_v29 = vld [vmem:[%s6329_s12 + $0xa8] sm:$0xf] }
  0x32   : > { %v747_v41 = vrot.slane %v745_v25, 5  ;;  %v6122_v26 = vld [vmem:[%s7327_s2 + $0x158] sm:$0xff]  }
  0x33   : > { %5478 = vmatpush3.bf16.msra.mxu0 %v6078_v16  ;;  %v702_v16 = vrot.slane %v700_v3, 4  ;;  %v6101_v3 = vld [vmem:[%s7327_s2 + $0xe0] sm:$0xff]  }
  0x34   : > { %5479 = vmatprep.subr.bf16.mxu0 %v6079_v17 }
  0x37   : > { %5480 = vmatpush3.bf16.msra.mxu0 %v6079_v17  ;;  %v705_v17 = vrot.slane %v703_v4, 5  ;;  %v6102_v4 = vld [vmem:[%s7327_s2 + $0xe8] sm:$0xff]  }
  0x38   : > { %5481 = vmatprep.subr.bf16.mxu0 %v6080_v18 }
  0x39   : > { %v706_v31 = vor.u32 %v705_v17, %v702_v16  ;;  %v4765_v16 = vld [vmem:[%s6329_s12 + $0x90] sm:$0xf]  ;;  %v6112_v17 = vld [vmem:[%s7327_s2 + $0x128] sm:$0xff]  }
  0x3b   : > { %5482 = vmatpush3.bf16.msra.mxu0 %v6080_v18  ;;  %v716_v18 = vrot.slane %v714_v5, 4  ;;  %v707_v42 = vrot.slane %v706_v31, 4  ;;  %v6103_v5 = vld [vmem:[%s7327_s2 + $0xf0] sm:$0xff]  }
  0x3c   : > { %5483 = vmatprep.subr.bf16.mxu0 %v6082_v23 }
  0x3d   : > { %v720_v32 = vor.u32 %v719_v19, %v716_v18  ;;  %v4767_v18 = vld [vmem:[%s6329_s12 + $0x98] sm:$0xf]  ;;  %v1268_v19 = vshrl.u32 %v4765_v16, 16 }
  0x3e   : > { %v1282_v22 = vshrl.u32 %v4767_v18, 16 }
  0x3f   : > { %5484 = vmatpush3.bf16.msra.mxu0 %v6082_v23  ;;  %v731_v23 = vshll.u32 %v636_v14, 16  ;;  %v721_v43 = vrot.slane %v720_v32, 4  ;;  %v6117_v14 = vld [vmem:[%s6329_s12 + $0xd8] ss:$8 sps:$4 sm:$0xff]  }
  0x40   : > { %5485 = vmatprep.subr.bf16.mxu0 %v6084_v27  ;;  %v1284_v31 = vrot.slane %v1282_v22, 4 }
  0x43   : > { %5486 = vmatpush3.bf16.msra.mxu0 %v6084_v27  ;;  %v697_v27 = vrot.slane %v695_v9, 5  ;;  %v6113_v9 = vld [vmem:[%s6329_s12 + $0xb0] ss:$8 sps:$4 sm:$0xff]  }
  0x44   : > { %5495 = vmatprep.subr.bf16.mxu0 %v6086_v33 }
  0x45   : > { %v698_v47 = vsel %vm6389_vm2, %v693_v30, %v697_v27  ;;  %v6116_v27 = vld [vmem:[%s7327_s2 + $0x138] sm:$0xff]  }
  0x46   : > { %5488 = vmatmul.mubr.bf16.vlgmr.msra.gmra.mrb[0].mxu0 %v6087_v36  ;;  %v6096_v36 = vld [vmem:[%s7327_s2 + $0xb8] sm:$0xff]  }
  0x47   : > { %5496 = vmatpush3.bf16.msra.mxu0 %v6086_v33  ;;  %5491 = vmatprep.mubr.bf16.mxu0 %v6093_v39  ;;  %v711_v33 = vrot.slane %v709_v20, 5  ;;  %v733_v39 = vrot.slane %v731_v23, 5  ;;  %v1271_v20 = vshll.u32 %v4765_v16, 16  ;;  %v1285_v23 = vshll.u32 %v4767_v18, 16  ;;  %v4768_v30 = vld [vmem:[%s6329_s12 + $0x9c] sm:$0x1] }
  0x48   : > { %5497 = vmatprep.subr.bf16.mxu0 %v6088_v40  ;;  %v6127_v18 = vld [vmem:[%s6329_s12 + $0x108] ss:$8 sps:$4 sm:$0xff]  }
  0x49   : > { %v734_v48 = vor.u32 %v733_v39, %v730_v38  ;;  %v712_v52 = vsel %vm6389_vm2, %v707_v42, %v711_v33  ;;  %v1273_v25 = vrot.slane %v1271_v20, 5  ;;  %v1287_v32 = vrot.slane %v1285_v23, 5  ;;  %v4773_v33 = vld [vmem:[%s6329_s12 + $0xb0] sm:$0xf]  ;;  %v4772_v38 = vld [vmem:[%s6329_s12 + $0xac] sm:$0x1] }
  0x4a   : > { %v1313_v42 = vshll.u32 %v4771_v29, 16  ;;  %v4780_v23 = vld [vmem:[%s6329_s12 + $0xcc] sm:$0x1] }
  0x4b   : > { %5498 = vmatpush3.bf16.msra.mxu0 %v6088_v40  ;;  %v744_v40 = vrot.slane %v742_v24, 4  ;;  %v1270_v24 = vrot.slane %v1268_v19, 4 }
  0x4c   : > { %5499 = vmatprep.subr.bf16.mxu0 %v6089_v50 }
  0x4d   : > { %v748_v49 = vor.u32 %v747_v41, %v744_v40  ;;  %v1310_v41 = vshrl.u32 %v4771_v29, 16 }
  0x4e   : > { %5492 = vmatmul.mubr.bf16.gmra.mrb[4].mxu0 %v6095_v53  ;;  %v726_v53 = vsel %vm6389_vm2, %v721_v43, %v725_v34  ;;  %v1274_v34 = vor.u32 %v1273_v25, %v1270_v24  ;;  %v1324_v43 = vshrl.u32 %v4773_v33, 16 }
  0x4f   : > { %5500 = vmatpush3.bf16.msra.mxu0 %v6089_v50  ;;  %5511 = vmatprep.mubr.bf16.mxu0 %v4681_v57  ;;  %v751_v50 = vshll.u32 %v639_v37, 16  ;;  %v4683_v56 = vcombine.low %v712_v52, %v726_v53  ;;  %v735_v57 = vrot.slane %v734_v48, 4  ;;  %v749_v58 = vrot.slane %v748_v49, 4  ;;  %v4775_v37 = vld [vmem:[%s6329_s12 + $0xb8] sm:$0xf] }
  0x50   : > { %5501 = vmatprep.subr.bf16.mxu0 %v6090_v54  ;;  %v1288_v48 = vor.u32 %v1287_v32, %v1284_v31  ;;  %v1291_v49 = vshll.u32 %v4768_v30, 16  ;;  %v6125_v52 = vld [vmem:[%s6329_s12 + $0xf8] ss:$8 sps:$4 sm:$0xff]   ;;  %v1275_v53 = vrot.slane %v1274_v34, 4 }
  0x51   : > { %v753_v59 = vrot.slane %v751_v50, 5  ;;  %v740_v62 = vsel %vm6389_vm2, %v735_v57, %v739_v55  ;;  %v1338_v50 = vshrl.u32 %v4775_v37, 16  ;;  %v6120_v57 = vld [vmem:[%s7327_s2 + $0x148] sm:$0xff]  }
  0x53   : > { %5502 = vmatpush3.bf16.msra.mxu0 %v6090_v54  ;;  %v4682_v54 = vcombine.low %v684_v44, %v698_v47  ;;  %v754_v63 = vsel %vm6389_vm2, %v749_v58, %v753_v59  ;;  %v1327_v44 = vshll.u32 %v4773_v33, 16  ;;  %v6119_v47 = vld [vmem:[%s6329_s12 + $0xe8] ss:$8 sps:$4 sm:$0xff]  }
  0x54   : > { %5503 = vmatprep.subr.bf16.mxu0 %v6091_v0  ;;  %v4684_v1 = vcombine.low %v740_v62, %v754_v63  ;;  %v4774_v62 = vld [vmem:[%s6329_s12 + $0xb4] sm:$0x1]  ;;  %v4776_v63 = vld [vmem:[%s6329_s12 + $0xbc] sm:$0x1] }
  0x57   : > { %5504 = vmatpush3.bf16.msra.mxu0 %v6091_v0  ;;  %v6100_v0 = vld [vmem:[%s7327_s2 + $0xd8] sm:$0xff]  }
  0x58   : > { %5505 = vmatprep.subr.bf16.mxu0 %v6092_v7 }
  0x5b   : > { %5506 = vmatpush3.bf16.msra.mxu0 %v6092_v7  ;;  %v6106_v7 = vld [vmem:[%s7327_s2 + $0x100] sm:$0xff]  }
  0x5c   : > { %5507 = vmatprep.subr.bf16.mxu0 %v6094_v28 }
  0x5f   : > { %5508 = vmatpush3.bf16.msra.mxu0 %v6094_v28  ;;  %v4769_v28 = vld [vmem:[%s6329_s12 + $0xa0] sm:$0xf] }
  0x60   : > { %5509 = vmatprep.subr.bf16.mxu0 %v6096_v36  ;;  %v1296_v39 = vshrl.u32 %v4769_v28, 16  ;;  %v1299_v40 = vshll.u32 %v4769_v28, 16 }
  0x62   : > { %v1298_v58 = vrot.slane %v1296_v39, 4  ;;  %v1301_v59 = vrot.slane %v1299_v40, 5  ;;  %v6123_v40 = vld [vmem:[%s7327_s2 + $0x160] sm:$0xff]  }
  0x63   : > { %5510 = vmatpush3.bf16.msra.mxu0 %v6096_v36  ;;  %v4770_v36 = vld [vmem:[%s6329_s12 + $0xa4] sm:$0x1] }
  0x64   : > { %5519 = vmatprep.subr.bf16.mxu0 %v6097_v51  ;;  %v1305_v55 = vshll.u32 %v4770_v36, 16 }
  0x66   : > { %5512 = vmatmul.mubr.bf16.vlgmr.msra.gmra.mrb[0].mxu0 %v4682_v54  ;;  %v1279_v54 = vrot.slane %v1277_v35, 5 }
  0x67   : > { %5520 = vmatpush3.bf16.msra.mxu0 %v6097_v51  ;;  %5515 = vmatprep.mubr.bf16.mxu0 %v4683_v56  ;;  %v1341_v51 = vshll.u32 %v4775_v37, 16  ;;  %v1319_v56 = vshll.u32 %v4772_v38, 16  ;;  %v1375_v37 = vshll.u32 %v4780_v23, 16 }
  0x68   : > { %5521 = vmatprep.subr.bf16.mxu0 %v6098_v60 }
  0x69   : > { %v1321_v16 = vrot.slane %v1319_v56, 5 }
  0x6b   : > { %5522 = vmatpush3.bf16.msra.mxu0 %v6098_v60  ;;  %v1312_v60 = vrot.slane %v1310_v41, 4 }
  0x6c   : > { %5523 = vmatprep.subr.bf16.mxu0 %v6099_v61 }
  0x6e   : > { %5516 = vmatmul.mubr.bf16.gmra.mrb[4].mxu0 %v4684_v1  ;;  %v1329_v1 = vrot.slane %v1327_v44, 5  ;;  %v6126_v44 = vld [vmem:[%s7327_s2 + $0x170] sm:$0xff]  }
  0x6f   : > { %5524 = vmatpush3.bf16.msra.mxu0 %v6099_v61  ;;  %5535 = vmatprep.mubr.bf16.mxu0 %v6105_v2  ;;  %v1315_v61 = vrot.slane %v1313_v42, 5  ;;  %v1289_v2 = vrot.slane %v1288_v48, 4  ;;  %v1377_v42 = vrot.slane %v1375_v37, 5 }
  0x70   : > { %5525 = vmatprep.subr.bf16.mxu0 %v6100_v0 }
  0x73   : > { %5526 = vmatpush3.bf16.msra.mxu0 %v6100_v0  ;;  %v1326_v0 = vrot.slane %v1324_v43, 4  ;;  %v6124_v43 = vld [vmem:[%s7327_s2 + $0x168] sm:$0xff]  }
  0x74   : > { %5527 = vmatprep.subr.bf16.mxu0 %v6101_v3 }
  0x77   : > { %5528 = vmatpush3.bf16.msra.mxu0 %v6101_v3  ;;  %v1293_v3 = vrot.slane %v1291_v49, 5 }
  0x78   : > { %5529 = vmatprep.subr.bf16.mxu0 %v6102_v4 }
  0x79   : > { %v1294_v19 = vsel %vm6389_vm2, %v1289_v2, %v1293_v3  ;;  %v6134_v2 = vld [vmem:[%s7327_s2 + $0x1a8] sm:$0xff]   ;;  %v6135_v3 = vld [vmem:[%s7327_s2 + $0x1b0] sm:$0xff]  }
  0x7b   : > { %5530 = vmatpush3.bf16.msra.mxu0 %v6102_v4  ;;  %v1340_v4 = vrot.slane %v1338_v50, 4 }
  0x7c   : > { %5531 = vmatprep.subr.bf16.mxu0 %v6103_v5 }
  0x7f   : > { %5532 = vmatpush3.bf16.msra.mxu0 %v6103_v5  ;;  %v1343_v5 = vrot.slane %v1341_v51, 5 }
  0x80   : > { %5533 = vmatprep.subr.bf16.mxu0 %v6104_v6 }
  0x81   : > { %v1344_v20 = vor.u32 %v1343_v5, %v1340_v4  ;;  %v6136_v4 = vld [vmem:[%s7327_s2 + $0x1b8] sm:$0xff]   ;;  %v6138_v5 = vld [vmem:[%s7327_s2 + $0x1c0] sm:$0xff]  }
  0x83   : > { %5534 = vmatpush3.bf16.msra.mxu0 %v6104_v6  ;;  %v4777_v6 = vld [vmem:[%s6329_s12 + $0xc0] sm:$0xf]  ;;  %v1345_v34 = vrot.slane %v1344_v20, 4 }
  0x84   : > { %5543 = vmatprep.subr.bf16.mxu0 %v6106_v7  ;;  %v1355_v22 = vshll.u32 %v4777_v6, 16 }
  0x86   : > { %5536 = vmatmul.mubr.bf16.vlgmr.msra.gmra.mrb[0].mxu0 %v6107_v8  ;;  %v1316_v8 = vor.u32 %v1315_v61, %v1312_v60  ;;  %v1357_v36 = vrot.slane %v1355_v22, 5  ;;  %v6131_v61 = vld [vmem:[%s7327_s2 + $0x190] sm:$0xff]   ;;  %v6148_v22 = vld [vmem:[%s7327_s2 + $0x1f8] sm:$0xff]  }
  0x87   : > { %5544 = vmatpush3.bf16.msra.mxu0 %v6106_v7  ;;  %5539 = vmatprep.mubr.bf16.mxu0 %v6113_v9  ;;  %v1302_v7 = vor.u32 %v1301_v59, %v1298_v58  ;;  %v1333_v9 = vshll.u32 %v4774_v62, 16  ;;  %v6130_v58 = vld [vmem:[%s7327_s2 + $0x188] sm:$0xff]  }
  0x88   : > { %5545 = vmatprep.subr.bf16.mxu0 %v6108_v10  ;;  %v1317_v28 = vrot.slane %v1316_v8, 4  ;;  %v6140_v8 = vld [vmem:[%s7327_s2 + $0x1c8] sm:$0xff]  }
  0x89   : > { %v1335_v29 = vrot.slane %v1333_v9, 5  ;;  %v6141_v9 = vld [vmem:[%s7327_s2 + $0x1d0] sm:$0xff]  }
  0x8a   : > { %v1322_v49 = vsel %vm6389_vm2, %v1317_v28, %v1321_v16  ;;  %v4883_v16 = vld [vmem:[%s6329_s12 + $0x10] sm:$0xf]  ;;  %v4884_v28 = vld [vmem:[%s6329_s12 + $0x14] sm:$0x1] }
  0x8b   : > { %5546 = vmatpush3.bf16.msra.mxu0 %v6108_v10  ;;  %v1347_v10 = vshll.u32 %v4776_v63, 16  ;;  %v6137_v63 = vld [vmem:[%s6329_s12 + $0x8] ss:$8 sps:$4 sm:$0xff]   ;;  %v1906_v20 = vshrl.u32 %v4883_v16, 16 }
  0x8c   : > { %5547 = vmatprep.subr.bf16.mxu0 %v6109_v11 }
  0x8d   : > { %v1349_v30 = vrot.slane %v1347_v10, 5  ;;  %v6147_v10 = vld [vmem:[%s6329_s12 + $0x38] ss:$8 sps:$4 sm:$0xff]  }
  0x8e   : > { %5540 = vmatmul.mubr.bf16.gmra.mrb[4].mxu0 %v6115_v12  ;;  %v4779_v12 = vld [vmem:[%s6329_s12 + $0xc8] sm:$0xf] }
  0x8f   : > { %5548 = vmatpush3.bf16.msra.mxu0 %v6109_v11  ;;  %5559 = vmatprep.mubr.bf16.mxu0 %v6117_v14  ;;  %v4778_v11 = vld [vmem:[%s6329_s12 + $0xc4] sm:$0x1]  ;;  %v1280_v14 = vsel %vm6389_vm2, %v1275_v53, %v1279_v54  ;;  %v1366_v25 = vshrl.u32 %v4779_v12, 16  ;;  %v1369_v33 = vshll.u32 %v4779_v12, 16  ;;  %v1350_v53 = vsel %vm6389_vm2, %v1345_v34, %v1349_v30  ;;  %v6142_v12 = vld [vmem:[%s7327_s2 + $0x1d8] sm:$0xff]  }
  0x90   : > { %5549 = vmatprep.subr.bf16.mxu0 %v6110_v13  ;;  %v1361_v24 = vshll.u32 %v4778_v11, 16  ;;  %v4797_v31 = vcombine.low %v1280_v14, %v1294_v19  ;;  %v6149_v11 = vld [vmem:[%s6329_s12 + $0x50] ss:$8 sps:$4 sm:$0xff]   ;;  %v6144_v14 = vld [vmem:[%s7327_s2 + $0x1e8] sm:$0xff]  }
  0x91   : > { %v1368_v39 = vrot.slane %v1366_v25, 4  ;;  %v1371_v41 = vrot.slane %v1369_v33, 5  ;;  %v1908_v25 = vrot.slane %v1906_v20, 4  ;;  %v1915_v33 = vshll.u32 %v4884_v28, 16  ;;  %v6151_v34 = vld [vmem:[%s6329_s12 + $0x60] ss:$8 sps:$4 sm:$0xff]  }
  0x92   : > { %v1363_v38 = vrot.slane %v1361_v24, 5  ;;  %v6159_v20 = vld [vmem:[%s7327_s2 + $0x230] sm:$0xff]  }
  0x93   : > { %5550 = vmatpush3.bf16.msra.mxu0 %v6110_v13  ;;  %v6121_v13 = vld [vmem:[%s7327_s2 + $0x150] sm:$0xff]   ;;  %v1372_v51 = vor.u32 %v1371_v41, %v1368_v39 }
  0x94   : > { %5551 = vmatprep.subr.bf16.mxu0 %v6111_v15  ;;  %v6153_v41 = vld [vmem:[%s7327_s2 + $0x210] sm:$0xff]  }
  0x97   : > { %5552 = vmatpush3.bf16.msra.mxu0 %v6111_v15  ;;  %v1307_v15 = vrot.slane %v1305_v55, 5 }
  0x98   : > { %5553 = vmatprep.subr.bf16.mxu0 %v6112_v17 }
  0x9b   : > { %5554 = vmatpush3.bf16.msra.mxu0 %v6112_v17  ;;  %v1330_v17 = vor.u32 %v1329_v1, %v1326_v0  ;;  %v6132_v0 = vld [vmem:[%s7327_s2 + $0x198] sm:$0xff]   ;;  %v6133_v1 = vld [vmem:[%s7327_s2 + $0x1a0] sm:$0xff]  }
  0x9c   : > { %5555 = vmatprep.subr.bf16.mxu0 %v6114_v21 }
  0x9d   : > { %v1331_v32 = vrot.slane %v1330_v17, 4  ;;  %v6146_v17 = vld [vmem:[%s7327_s2 + $0x1f0] sm:$0xff]  }
  0x9f   : > { %5556 = vmatpush3.bf16.msra.mxu0 %v6114_v21  ;;  %v1352_v21 = vshrl.u32 %v4777_v6, 16  ;;  %v6139_v6 = vld [vmem:[%s6329_s12 + $0x18] ss:$8 sps:$4 sm:$0xff]  }
  0xa0   : > { %5557 = vmatprep.subr.bf16.mxu0 %v6116_v27 }
  0xa1   : > { %v1354_v35 = vrot.slane %v1352_v21, 4  ;;  %v1909_v21 = vshll.u32 %v4883_v16, 16 }
  0xa3   : > { %5558 = vmatpush3.bf16.msra.mxu0 %v6116_v27  ;;  %v1303_v27 = vrot.slane %v1302_v7, 4  ;;  %v1358_v50 = vor.u32 %v1357_v36, %v1354_v35  ;;  %v6145_v7 = vld [vmem:[%s6329_s12 + $0x28] ss:$8 sps:$4 sm:$0xff]  }
  0xa4   : > { %5567 = vmatprep.subr.bf16.mxu0 %v6118_v45  ;;  %v6157_v35 = vld [vmem:[%s6329_s12 + $0x70] ss:$8 sps:$4 sm:$0xff]   ;;  %v6152_v36 = vld [vmem:[%s7327_s2 + $0x208] sm:$0xff]  }
  0xa5   : > { %v1308_v48 = vsel %vm6389_vm2, %v1303_v27, %v1307_v15  ;;  %v1359_v56 = vrot.slane %v1358_v50, 4  ;;  %v4881_v15 = vld [vmem:[%s6329_s12 + $0x8] sm:$0xf]  ;;  %v4882_v27 = vld [vmem:[%s6329_s12 + $0xc] sm:$0x1] }
  0xa6   : > { %5560 = vmatmul.mubr.bf16.vlgmr.msra.gmra.mrb[0].mxu0 %v6119_v47  ;;  %v6129_v47 = vld [vmem:[%s7327_s2 + $0x180] sm:$0xff]   ;;  %v4798_v54 = vcombine.low %v1308_v48, %v1322_v49  ;;  %v1895_v19 = vshll.u32 %v4881_v15, 16  ;;  %v6154_v49 = vld [vmem:[%s7327_s2 + $0x218] sm:$0xff]   ;;  %v4889_v50 = vld [vmem:[%s6329_s12 + $0x28] sm:$0xf] }
  0xa7   : > { %5568 = vmatpush3.bf16.msra.mxu0 %v6118_v45  ;;  %5563 = vmatprep.mubr.bf16.mxu0 %v6125_v52  ;;  %v6128_v45 = vld [vmem:[%s7327_s2 + $0x178] sm:$0xff]   ;;  %v1336_v52 = vsel %vm6389_vm2, %v1331_v32, %v1335_v29  ;;  %v1364_v59 = vsel %vm6389_vm2, %v1359_v56, %v1363_v38  ;;  %v6150_v29 = vld [vmem:[%s7327_s2 + $0x200] sm:$0xff]  }
  0xa8   : > { %5569 = vmatprep.subr.bf16.mxu0 %v6120_v57  ;;  %v4799_v55 = vcombine.low %v1336_v52, %v1350_v53  ;;  %v1897_v24 = vrot.slane %v1895_v19, 5  ;;  %v4887_v48 = vld [vmem:[%s6329_s12 + $0x20] sm:$0xf] }
  0xa9   : > { %v6155_v56 = vld [vmem:[%s7327_s2 + $0x220] sm:$0xff]  }
  0xab   : > { %5570 = vmatpush3.bf16.msra.mxu0 %v6120_v57  ;;  %v1373_v57 = vrot.slane %v1372_v51, 4  ;;  %v4891_v51 = vld [vmem:[%s6329_s12 + $0x30] sm:$0xf] }
  0xac   : > { %5571 = vmatprep.subr.bf16.mxu0 %v6121_v13 }
  0xad   : > { %v1378_v60 = vsel %vm6389_vm2, %v1373_v57, %v1377_v42  ;;  %v1948_v57 = vshrl.u32 %v4889_v50, 16 }
  0xae   : > { %5564 = vmatmul.mubr.bf16.gmra.mrb[4].mxu0 %v6127_v18  ;;  %v4800_v62 = vcombine.low %v1364_v59, %v1378_v60  ;;  %v1892_v18 = vshrl.u32 %v4881_v15, 16  ;;  %v1962_v59 = vshrl.u32 %v4891_v51, 16  ;;  %v1965_v60 = vshll.u32 %v4891_v51, 16 }
  0xaf   : > { %5572 = vmatpush3.bf16.msra.mxu0 %v6121_v13  ;;  %5583 = vmatprep.mubr.bf16.mxu0 %v4797_v31  ;;  %v6143_v13 = vld [vmem:[%s7327_s2 + $0x1e0] sm:$0xff]   ;;  %v1901_v31 = vshll.u32 %v4882_v27, 16 }
  0xb0   : > { %5573 = vmatprep.subr.bf16.mxu0 %v6122_v26  ;;  %v1894_v23 = vrot.slane %v1892_v18, 4 }
  0xb1   : > { %v1903_v38 = vrot.slane %v1901_v31, 5 }
  0xb2   : > { %v1898_v30 = vor.u32 %v1897_v24, %v1894_v23 }
  0xb3   : > { %5574 = vmatpush3.bf16.msra.mxu0 %v6122_v26  ;;  %v1911_v26 = vrot.slane %v1909_v21, 5 }
  0xb4   : > { %5575 = vmatprep.subr.bf16.mxu0 %v6123_v40  ;;  %v1899_v37 = vrot.slane %v1898_v30, 4  ;;  %v4894_v30 = vld [vmem:[%s6329_s12 + $0x3c] sm:$0x1] }
  0xb5   : > { %v1912_v32 = vor.u32 %v1911_v26, %v1908_v25  ;;  %v6160_v25 = vld [vmem:[%s7327_s2 + $0x238] sm:$0xff]  }
  0xb6   : > { %v1904_v42 = vsel %vm6389_vm2, %v1899_v37, %v1903_v38 }
  0xb7   : > { %5576 = vmatpush3.bf16.msra.mxu0 %v6123_v40  ;;  %v1913_v39 = vrot.slane %v1912_v32, 4  ;;  %v1917_v40 = vrot.slane %v1915_v33, 5 }
  0xb8   : > { %5577 = vmatprep.subr.bf16.mxu0 %v6124_v43 }
  0xbb   : > { %5578 = vmatpush3.bf16.msra.mxu0 %v6124_v43  ;;  %v1918_v43 = vsel %vm6389_vm2, %v1913_v39, %v1917_v40  ;;  %v4896_v39 = vld [vmem:[%s6329_s12 + $0x44] sm:$0x1] }
  0xbc   : > { %5579 = vmatprep.subr.bf16.mxu0 %v6126_v44 }
  0xbf   : > { %5580 = vmatpush3.bf16.msra.mxu0 %v6126_v44  ;;  %v6158_v44 = vld [vmem:[%s6329_s12 + $0x80] ss:$8 sps:$4 sm:$0xff]  }
  0xc0   : > { %5581 = vmatprep.subr.bf16.mxu0 %v6128_v45 }
  0xc3   : > { %5582 = vmatpush3.bf16.msra.mxu0 %v6128_v45  ;;  %v4913_v45 = vcombine.low %v1904_v42, %v1918_v43 }
  0xc4   : > { %5591 = vmatprep.subr.bf16.mxu0 %v6129_v47 }
  0xc6   : > { %5584 = vmatmul.mubr.bf16.vlgmr.msra.gmra.mrb[0].mxu0 %v4798_v54  ;;  %v1934_v54 = vshrl.u32 %v4887_v48, 16 }
  0xc7   : > { %5592 = vmatpush3.bf16.msra.mxu0 %v6129_v47  ;;  %5587 = vmatprep.mubr.bf16.mxu0 %v4799_v55  ;;  %v4885_v47 = vld [vmem:[%s6329_s12 + $0x18] sm:$0xf]  ;;  %v1937_v55 = vshll.u32 %v4887_v48, 16 }
  0xc8   : > { %5593 = vmatprep.subr.bf16.mxu0 %v6130_v58  ;;  %v1920_v52 = vshrl.u32 %v4885_v47, 16  ;;  %v1923_v53 = vshll.u32 %v4885_v47, 16 }
  0xcb   : > { %5594 = vmatpush3.bf16.msra.mxu0 %v6130_v58  ;;  %v1951_v58 = vshll.u32 %v4889_v50, 16 }
  0xcc   : > { %5595 = vmatprep.subr.bf16.mxu0 %v6131_v61 }
  0xce   : > { %5588 = vmatmul.mubr.bf16.gmra.mrb[4].mxu0 %v4800_v62  ;;  %v1922_v62 = vrot.slane %v1920_v52, 4 }
  0xcf   : > { %5596 = vmatpush3.bf16.msra.mxu0 %v6131_v61  ;;  %5607 = vmatprep.mubr.bf16.mxu0 %v6137_v63  ;;  %v6156_v61 = vld [vmem:[%s7327_s2 + $0x228] sm:$0xff]   ;;  %v1925_v63 = vrot.slane %v1923_v53, 5 }
  0xd0   : > { %5597 = vmatprep.subr.bf16.mxu0 %v6132_v0 }
  0xd3   : > { %5598 = vmatpush3.bf16.msra.mxu0 %v6132_v0  ;;  %v1936_v0 = vrot.slane %v1934_v54, 4 }
  0xd4   : > { %5599 = vmatprep.subr.bf16.mxu0 %v6133_v1 }
  0xd7   : > { %5600 = vmatpush3.bf16.msra.mxu0 %v6133_v1  ;;  %v1939_v1 = vrot.slane %v1937_v55, 5 }
  0xd8   : > { %5601 = vmatprep.subr.bf16.mxu0 %v6134_v2 }
  0xdb   : > { %5602 = vmatpush3.bf16.msra.mxu0 %v6134_v2  ;;  %v4886_v2 = vld [vmem:[%s6329_s12 + $0x1c] sm:$0x1] }
  0xdc   : > { %5603 = vmatprep.subr.bf16.mxu0 %v6135_v3 }
  0xdf   : > { %5604 = vmatpush3.bf16.msra.mxu0 %v6135_v3  ;;  %v4888_v3 = vld [vmem:[%s6329_s12 + $0x24] sm:$0x1] }
  0xe0   : > { %5605 = vmatprep.subr.bf16.mxu0 %v6136_v4  ;;  %v1943_v15 = vshll.u32 %v4888_v3, 16  ;;  %v6690_v3 = vld [vmem:[%s7328_s3] sm:$0xff]  }
  0xe3   : > { %5606 = vmatpush3.bf16.msra.mxu0 %v6136_v4  ;;  %v4893_v4 = vld [vmem:[%s6329_s12 + $0x38] sm:$0xf] }
  0xe4   : > { %5615 = vmatprep.subr.bf16.mxu0 %v6138_v5  ;;  %v1976_v16 = vshrl.u32 %v4893_v4, 16 }
  0xe6   : > { %5608 = vmatmul.mubr.bf16.vlgmr.msra.gmra.mrb[0].mxu0 %v6139_v6  ;;  %v1953_v6 = vrot.slane %v1951_v58, 5  ;;  %v1978_v31 = vrot.slane %v1976_v16, 4  ;;  %v6161_v58 = vld [vmem:[%s7328_s3 + $0x40] sm:$0xff]  }
  0xe7   : > { %5616 = vmatpush3.bf16.msra.mxu0 %v6138_v5  ;;  %5611 = vmatprep.mubr.bf16.mxu0 %v6145_v7  ;;  %v1950_v5 = vrot.slane %v1948_v57, 4  ;;  %v1964_v7 = vrot.slane %v1962_v59, 4  ;;  %v6265_v59 = vmov 0  }
  0xe8   : > { %5617 = vmatprep.subr.bf16.mxu0 %v6140_v8  ;;  %5663 = vmatprep.subr.bf16.mxu1 %v6161_v58  ;;  %2217 = vst [vmem:[#allocation2 + $0x18] sm:$0xf] %v6265_v59  ;;  %2218 = vst [vmem:[#allocation2 + $0x1c] sm:$0x1] %v6265_v59 }
  0xe9   : > { %v1954_v21 = vor.u32 %v1953_v6, %v1950_v5  ;;  %5664 = vmatpush3.bf16.msra.mxu1 %v6161_v58  ;;  %2211 = vst [vmem:[#allocation2] sm:$0xf] %v6265_v59  ;;  %2212 = vst [vmem:[#allocation2 + $0x4] sm:$0x1] %v6265_v59  ;;  %v6698_v5 = vld [vmem:[%s7329_s4] ss:$0 sm:$0xff] }
  0xea   : > { %2213 = vst [vmem:[#allocation2 + $0x8] sm:$0xf] %v6265_v59  ;;  %2214 = vst [vmem:[#allocation2 + $0xc] sm:$0x1] %v6265_v59 }
  0xeb   : > { %5618 = vmatpush3.bf16.msra.mxu0 %v6140_v8  ;;  %v1967_v8 = vrot.slane %v1965_v60, 5  ;;  %2215 = vst [vmem:[#allocation2 + $0x10] sm:$0xf] %v6265_v59  ;;  %2216 = vst [vmem:[#allocation2 + $0x14] sm:$0x1] %v6265_v59  ;;  %v6162_v60 = vld [vmem:[%s7328_s3 + $0x48] sm:$0xff]  }
  0xec   : > { %5619 = vmatprep.subr.bf16.mxu0 %v6141_v9  ;;  %2219 = vst [vmem:[#allocation2 + $0x20] sm:$0xf] %v6265_v59  ;;  %2220 = vst [vmem:[#allocation2 + $0x24] sm:$0x1] %v6265_v59  ;;  %5665 = vmatprep.subr.bf16.mxu1 %v6162_v60 }
  0xed   : > { %v1968_v23 = vor.u32 %v1967_v8, %v1964_v7  ;;  %2221 = vst [vmem:[#allocation2 + $0x28] sm:$0xf] %v6265_v59  ;;  %2222 = vst [vmem:[#allocation2 + $0x2c] sm:$0x1] %v6265_v59  ;;  %5666 = vmatpush3.bf16.msra.mxu1 %v6162_v60  ;;  %v6703_v7 = vld [vmem:[%s7330_s5] ss:$0 sm:$0xff] }
  0xee   : > { %5612 = vmatmul.mubr.bf16.gmra.mrb[4].mxu0 %v6147_v10  ;;  %v4890_v10 = vld [vmem:[%s6329_s12 + $0x2c] sm:$0x1]  ;;  %2223 = vst [vmem:[#allocation2 + $0x30] sm:$0xf] %v6265_v59  ;;  %2224 = vst [vmem:[#allocation2 + $0x34] sm:$0x1] %v6265_v59 }
  0xef   : > { %5620 = vmatpush3.bf16.msra.mxu0 %v6141_v9  ;;  %5631 = vmatprep.mubr.bf16.mxu0 %v6149_v11  ;;  %v4895_v9 = vld [vmem:[%s6329_s12 + $0x40] sm:$0xf]  ;;  %v4892_v11 = vld [vmem:[%s6329_s12 + $0x34] sm:$0x1]  ;;  %v1969_v37 = vrot.slane %v1968_v23, 4 }
  0xf0   : > { %5621 = vmatprep.subr.bf16.mxu0 %v6142_v12  ;;  %v1990_v18 = vshrl.u32 %v4895_v9, 16  ;;  %v1993_v19 = vshll.u32 %v4895_v9, 16  ;;  %v1971_v24 = vshll.u32 %v4892_v11, 16  ;;  %2225 = vst [vmem:[#allocation2 + $0x38] sm:$0xf] %v6265_v59 }
  0xf1   : > { %2226 = vst [vmem:[#allocation2 + $0x3c] sm:$0x1] %v6265_v59  ;;  %2227 = vst [vmem:[#allocation2 + $0x40] sm:$0xf] %v6265_v59  ;;  %v2347_v58 = vld [vmem:[#allocation2 + $0x8] sm:$0xf] }
  0xf2   : > { %v1992_v33 = vrot.slane %v1990_v18, 4  ;;  %v1973_v38 = vrot.slane %v1971_v24, 5  ;;  %2228 = vst [vmem:[#allocation2 + $0x44] sm:$0x1] %v6265_v59  ;;  %2229 = vst [vmem:[#allocation2 + $0x48] sm:$0xf] %v6265_v59 }
  0xf3   : > { %5622 = vmatpush3.bf16.msra.mxu0 %v6142_v12  ;;  %v1926_v12 = vor.u32 %v1925_v63, %v1922_v62  ;;  %2230 = vst [vmem:[#allocation2 + $0x4c] sm:$0x1] %v6265_v59  ;;  %v6164_v62 = vld [vmem:[%s7328_s3 + $0x58] sm:$0xff]   ;;  %v6165_v63 = vld [vmem:[%s7328_s3 + $0x60] sm:$0xff]  }
  0xf4   : > { %5623 = vmatprep.subr.bf16.mxu0 %v6143_v13  ;;  %v1974_v48 = vsel %vm6389_vm2, %v1969_v37, %v1973_v38 }
  0xf5   : > { %v1927_v26 = vrot.slane %v1926_v12, 4 }
  0xf7   : > { %5624 = vmatpush3.bf16.msra.mxu0 %v6143_v13  ;;  %v1929_v13 = vshll.u32 %v4886_v2, 16  ;;  %v6168_v2 = vld [vmem:[%s7328_s3 + $0x78] sm:$0xff]  }
  0xf8   : > { %5625 = vmatprep.subr.bf16.mxu0 %v6144_v14 }
  0xf9   : > { %v1931_v27 = vrot.slane %v1929_v13, 5 }
  0xfb   : > { %5626 = vmatpush3.bf16.msra.mxu0 %v6144_v14  ;;  %v1940_v14 = vor.u32 %v1939_v1, %v1936_v0  ;;  %v1932_v40 = vsel %vm6389_vm2, %v1927_v26, %v1931_v27  ;;  %v6166_v0 = vld [vmem:[%s7328_s3 + $0x68] sm:$0xff]   ;;  %v6167_v1 = vld [vmem:[%s7328_s3 + $0x70] sm:$0xff]  }
  0xfc   : > { %5627 = vmatprep.subr.bf16.mxu0 %v6146_v17 }
  0xfd   : > { %v1941_v28 = vrot.slane %v1940_v14, 4 }
  0xff   : > { %5628 = vmatpush3.bf16.msra.mxu0 %v6146_v17  ;;  %v1979_v17 = vshll.u32 %v4893_v4, 16  ;;  %v6693_v4 = vld [vmem:[#allocation2] sm:$0xf] }
 0x100   : > { %5629 = vmatprep.subr.bf16.mxu0 %v6148_v22  ;;  %v2431_v8 = vshrl.u32 %v6693_v4, 16  ;;  %v2434_v11 = vshll.u32 %v6693_v4, 16 }
 0x101   : > { %v1981_v32 = vrot.slane %v1979_v17, 5 }
 0x103   : > { %5630 = vmatpush3.bf16.msra.mxu0 %v6148_v22  ;;  %v1957_v22 = vshll.u32 %v4890_v10, 16  ;;  %v1982_v43 = vor.u32 %v1981_v32, %v1978_v31 }
 0x104   : > { %5639 = vmatprep.subr.bf16.mxu0 %v6150_v29 }
 0x105   : > { %v1983_v52 = vrot.slane %v1982_v43, 4  ;;  %v2362_v43 = vld [vmem:[#allocation2 + $0x18] sm:$0xf] }
 0x106   : > { %5632 = vmatmul.mubr.bf16.vlgmr.msra.gmra.mrb[0].mxu0 %v6151_v34  ;;  %v1995_v34 = vrot.slane %v1993_v19, 5  ;;  %v6713_v19 = vrot.slane %v2431_v8, 4  ;;  %v2368_v8 = vld [vmem:[#allocation2 + $0x20] sm:$0xf] }
 0x107   : > { %5640 = vmatpush3.bf16.msra.mxu0 %v6150_v29  ;;  %5635 = vmatprep.mubr.bf16.mxu0 %v6157_v35  ;;  %v1945_v29 = vrot.slane %v1943_v15, 5  ;;  %v1955_v35 = vrot.slane %v1954_v21, 4 }
 0x108   : > { %5641 = vmatprep.subr.bf16.mxu0 %v6152_v36 }
 0x109   : > { %v1946_v42 = vsel %vm6389_vm2, %v1941_v28, %v1945_v29 }
 0x10b   : > { %5642 = vmatpush3.bf16.msra.mxu0 %v6152_v36  ;;  %v1959_v36 = vrot.slane %v1957_v22, 5  ;;  %v6716_v22 = vrot.slane %v2434_v11, 5 }
 0x10c   : > { %5643 = vmatprep.subr.bf16.mxu0 %v6153_v41 }
 0x10d   : > { %v1960_v47 = vsel %vm6389_vm2, %v1955_v35, %v1959_v36  ;;  %v2437_v37 = vor.u32 %v6716_v22, %v6713_v19 }
 0x10e   : > { %5636 = vmatmul.mubr.bf16.gmra.mrb[4].mxu0 %v6158_v44  ;;  %v1996_v44 = vor.u32 %v1995_v34, %v1992_v33  ;;  %v4915_v51 = vcombine.low %v1960_v47, %v1974_v48 }
 0x10f   : > { %5644 = vmatpush3.bf16.msra.mxu0 %v6153_v41  ;;  %5655 = vmatprep.mubr.bf16.mxu0 %v4913_v45  ;;  %v1985_v41 = vshll.u32 %v4894_v30, 16  ;;  %v1999_v45 = vshll.u32 %v4896_v39, 16 }
 0x110   : > { %5645 = vmatprep.subr.bf16.mxu0 %v6154_v49  ;;  %v1997_v53 = vrot.slane %v1996_v44, 4 }
 0x111   : > { %v1987_v50 = vrot.slane %v1985_v41, 5  ;;  %v2001_v54 = vrot.slane %v1999_v45, 5 }
 0x113   : > { %5646 = vmatpush3.bf16.msra.mxu0 %v6154_v49  ;;  %v4914_v49 = vcombine.low %v1932_v40, %v1946_v42  ;;  %v1988_v55 = vsel %vm6389_vm2, %v1983_v52, %v1987_v50  ;;  %v2365_v52 = vld [vmem:[#allocation2 + $0x1c] sm:$0x1] }
 0x114   : > { %5647 = vmatprep.subr.bf16.mxu0 %v6155_v56 }
 0x117   : > { %5648 = vmatpush3.bf16.msra.mxu0 %v6155_v56  ;;  %v2002_v56 = vsel %vm6389_vm2, %v1997_v53, %v2001_v54 }
 0x118   : > { %5649 = vmatprep.subr.bf16.mxu0 %v6156_v61  ;;  %v4916_v57 = vcombine.low %v1988_v55, %v2002_v56 }
 0x11b   : > { %5650 = vmatpush3.bf16.msra.mxu0 %v6156_v61  ;;  %v6163_v61 = vld [vmem:[%s7328_s3 + $0x50] sm:$0xff]  }
 0x11c   : > { %5651 = vmatprep.subr.bf16.mxu0 %v6159_v20  ;;  %5667 = vmatprep.subr.bf16.mxu1 %v6163_v61 }
 0x11d   : > { %5668 = vmatpush3.bf16.msra.mxu1 %v6163_v61 }
 0x11e   : > { %5669 = vmatprep.subr.bf16.mxu1 %v6164_v62 }
 0x11f   : > { %5652 = vmatpush3.bf16.msra.mxu0 %v6159_v20 }
 0x120   : > { %5653 = vmatprep.subr.bf16.mxu0 %v6160_v25 }
 0x121   : > { %5670 = vmatpush3.bf16.msra.mxu1 %v6164_v62 }
 0x122   : > { %5671 = vmatprep.subr.bf16.mxu1 %v6165_v63 }
 0x123   : > { %5654 = vmatpush3.bf16.msra.mxu0 %v6160_v25  ;;  %v6719_v25 = vld [vmem:[#allocation2 + $0x4] sm:$0x1] }
 0x124   : > { %v2440_v28 = vshll.u32 %v6719_v25, 16 }
 0x125   : > { %5672 = vmatpush3.bf16.msra.mxu1 %v6165_v63  ;;  %v2353_v63 = vld [vmem:[#allocation2 + $0xc] sm:$0x1] }
 0x126   : > { %5656 = vmatmul.mubr.bf16.vlgmr.msra.gmra.mrb[0].mxu0 %v4914_v49  ;;  %5673 = vmatprep.subr.bf16.mxu1 %v6166_v0 }
 0x127   : > { %5659 = vmatprep.mubr.bf16.mxu0 %v4915_v51 }
 0x129   : > { %5674 = vmatpush3.bf16.msra.mxu1 %v6166_v0 }
 0x12a   : > { %5675 = vmatprep.subr.bf16.mxu1 %v6167_v1 }
 0x12d   : > { %5676 = vmatpush3.bf16.msra.mxu1 %v6167_v1 }
 0x12e   : > { %5660 = vmatmul.mubr.bf16.gmra.mrb[4].mxu0 %v4916_v57  ;;  %5677 = vmatprep.subr.bf16.mxu1 %v6168_v2 }
 0x131   : > { %5678 = vmatpush3.bf16.msra.mxu1 %v6168_v2 }
 0x132   : > { %5687 = vmatprep.subr.bf16.mxu1 %v6690_v3 }
 0x1f9   : > { %v5657_v6 = vpop.f32.mrb[0].mxu0 }
 0x1fa   : > { %v2166_v9 = vmul.f32 %v5657_v6, %v6698_v5  ;;  %v2118_v10 = vpop.f32.mrb[1].mxu0 }
 0x1fb   : > { %v2164_v12 = vmul.f32 %v6698_v5, %v2118_v10  ;;  %v5658_v13 = vpop.f32.mrb[2].mxu0 }
 0x1fc   : > { %v2181_v14 = vadd.f32 %v6703_v7, %v2166_v9  ;;  %v2167_v15 = vmul.f32 %v5658_v13, %v6698_v5  ;;  %v2121_v16 = vpop.f32.mrb[3].mxu0  ;;  %v2371_v9 = vld [vmem:[#allocation2 + $0x24] sm:$0x1] }
 0x1fd   : > { %v2179_v17 = vadd.f32 %v6703_v7, %v2164_v12  ;;  %v2165_v18 = vmul.f32 %v6698_v5, %v2121_v16  ;;  %v2356_v16 = vld [vmem:[#allocation2 + $0x10] sm:$0xf] }
 0x1fe   : > { %vm2189_vm6 = vcmp.ge.f32.partialorder %v2181_v14, 0.0  ;;  %v2197_v20 = vmul.f32 0.1, %v2181_v14  ;;  %v2182_v21 = vadd.f32 %v6703_v7, %v2167_v15 }
 0x1ff   : > { %vm2187_vm8 = vcmp.ge.f32.partialorder %v2179_v17, 0.0  ;;  %v2195_v23 = vmul.f32 0.1, %v2179_v17  ;;  %v2180_v24 = vadd.f32 %v6703_v7, %v2165_v18 }
 0x200   : > { %v2205_v26 = vsel %vm2189_vm6, %v2181_v14, %v2197_v20  ;;  %vm2190_vm9 = vcmp.ge.f32.partialorder %v2182_v21, 0.0  ;;  %v2198_v27 = vmul.f32 0.1, %v2182_v21 }
 0x201   : > { %v5213_v29 = vpack.c.bf16 %v2205_v26, %v2205_v26  ;;  %v2203_v30 = vsel %vm2187_vm8, %v2179_v17, %v2195_v23  ;;  %vm2188_vm10 = vcmp.ge.f32.partialorder %v2180_v24, 0.0  ;;  %v2196_v31 = vmul.f32 0.1, %v2180_v24  ;;  %v5661_v32 = vpop.f32.mrb[4].mxu0  ;;  %v2359_v17 = vld [vmem:[#allocation2 + $0x14] sm:$0x1] }
 0x202   : > { %v5211_v33 = vpack.c.bf16 %v2203_v30, %v2203_v30  ;;  %v2206_v34 = vsel %vm2190_vm9, %v2182_v21, %v2198_v27  ;;  %v2170_v35 = vmul.f32 %v5661_v32, %v6698_v5  ;;  %v2134_v36 = vpop.f32.mrb[5].mxu0 }
 0x203   : > { %v2280_v38 = vshrl.u32 %v5213_v29, 16  ;;  %v2283_v39 = vshll.u32 %v5213_v29, 16  ;;  %v5214_v40 = vpack.c.bf16 %v2206_v34, %v2206_v34  ;;  %v2204_v41 = vsel %vm2188_vm10, %v2180_v24, %v2196_v31  ;;  %v5662_v42 = vpop.f32.mrb[6].mxu0 }
 0x204   : > { %v2264_v44 = vshrl.u32 %v5211_v33, 16  ;;  %v2267_v45 = vshll.u32 %v5211_v33, 16  ;;  %v5212_v47 = vpack.c.bf16 %v2204_v41, %v2204_v41  ;;  %v2185_v48 = vadd.f32 %v6703_v7, %v2170_v35  ;;  %v2137_v49 = vpop.f32.mrb[7].mxu0 }
 0x205   : > { %v2282_v50 = vrot.slane %v2280_v38, 7  ;;  %v2288_v53 = vshrl.u32 %v5214_v40, 16  ;;  %v2291_v54 = vshll.u32 %v5214_v40, 16  ;;  %v2168_v55 = vmul.f32 %v6698_v5, %v2134_v36  ;;  %v2386_v38 = vld [vmem:[#allocation2 + $0x38] sm:$0xf] }
 0x206   : > { %v2266_v57 = vrot.slane %v2264_v44, 7  ;;  %v2272_v59 = vshrl.u32 %v5212_v47, 16  ;;  %v2275_v60 = vshll.u32 %v5212_v47, 16  ;;  %vm2193_vm13 = vcmp.ge.f32.partialorder %v2185_v48, 0.0 }
 0x207   : > { %v2285_v61 = vor.u32 %v2283_v39, %v2282_v50  ;;  %v2286_v62 = vrot.slane %v2282_v50, 4  ;;  %v2290_v0 = vrot.slane %v2288_v53, 7  ;;  %v2201_v1 = vmul.f32 0.1, %v2185_v48 }
 0x208   : > { %v2269_v2 = vor.u32 %v2267_v45, %v2266_v57  ;;  %v2270_v6 = vrot.slane %v2266_v57, 4  ;;  %v2274_v10 = vrot.slane %v2272_v59, 7  ;;  %v2183_v11 = vadd.f32 %v6703_v7, %v2168_v55  ;;  %v2389_v45 = vld [vmem:[#allocation2 + $0x3c] sm:$0x1]  ;;  %v2377_v59 = vld [vmem:[#allocation2 + $0x2c] sm:$0x1] }
 0x209   : > { %v2363_v12 = vsel %vm6728_vm11, %v2285_v61, %v2362_v43  ;;  %v2366_v13 = vsel %vm6735_vm12, %v2286_v62, %v2365_v52  ;;  %v2293_v14 = vor.u32 %v2291_v54, %v2290_v0  ;;  %v2294_v15 = vrot.slane %v2290_v0, 4 }
 0x20a   : > { %2364 = vst [vmem:[#allocation2 + $0x18] sm:$0xf] %v2363_v12  ;;  %2367 = vst [vmem:[#allocation2 + $0x1c] sm:$0x1] %v2366_v13  ;;  %v2348_v18 = vsel %vm6728_vm11, %v2269_v2, %v2347_v58  ;;  %v2354_v20 = vsel %vm6735_vm12, %v2270_v6, %v2353_v63  ;;  %v2277_v21 = vor.u32 %v2275_v60, %v2274_v10  ;;  %v2278_v23 = vrot.slane %v2274_v10, 4 }
 0x20b   : > { %2349 = vst [vmem:[#allocation2 + $0x8] sm:$0xf] %v2348_v18  ;;  %2355 = vst [vmem:[#allocation2 + $0xc] sm:$0x1] %v2354_v20  ;;  %v2369_v24 = vsel %vm6728_vm11, %v2293_v14, %v2368_v8  ;;  %v2372_v26 = vsel %vm6735_vm12, %v2294_v15, %v2371_v9  ;;  %v2209_v27 = vsel %vm2193_vm13, %v2185_v48, %v2201_v1  ;;  %vm2191_vm14 = vcmp.ge.f32.partialorder %v2183_v11, 0.0 }
 0x20c   : > { %2370 = vst [vmem:[#allocation2 + $0x20] sm:$0xf] %v2369_v24  ;;  %2373 = vst [vmem:[#allocation2 + $0x24] sm:$0x1] %v2372_v26  ;;  %v2357_v29 = vsel %vm6728_vm11, %v2277_v21, %v2356_v16  ;;  %v2360_v30 = vsel %vm6735_vm12, %v2278_v23, %v2359_v17  ;;  %v5217_v31 = vpack.c.bf16 %v2209_v27, %v2209_v27  ;;  %v2199_v32 = vmul.f32 0.1, %v2183_v11 }
 0x20d   : > { %2358 = vst [vmem:[#allocation2 + $0x10] sm:$0xf] %v2357_v29  ;;  %2361 = vst [vmem:[#allocation2 + $0x14] sm:$0x1] %v2360_v30  ;;  %v2171_v33 = vmul.f32 %v5662_v42, %v6698_v5  ;;  %v2169_v34 = vmul.f32 %v6698_v5, %v2137_v49  ;;  %v6764_v47 = vrot.slane %v2437_v37, 4  ;;  %v6768_v42 = vrot.slane %v2440_v28, 5 }
 0x20e   : > { %v2312_v35 = vshrl.u32 %v5217_v31, 16  ;;  %v2207_v36 = vsel %vm2191_vm14, %v2183_v11, %v2199_v32  ;;  %v2315_v44 = vshll.u32 %v5217_v31, 16  ;;  %v2374_v58 = vld [vmem:[#allocation2 + $0x28] sm:$0xf]  ;;  %v2392_v15 = vld [vmem:[#allocation2 + $0x40] sm:$0xf] }
 0x20f   : > { %v5215_v39 = vpack.c.bf16 %v2207_v36, %v2207_v36  ;;  %v2186_v40 = vadd.f32 %v6703_v7, %v2171_v33  ;;  %v2184_v41 = vadd.f32 %v6703_v7, %v2169_v34  ;;  %v2443_v8 = vsel %vm6389_vm2, %v6764_v47, %v6768_v42  ;;  %v2395_v16 = vld [vmem:[#allocation2 + $0x44] sm:$0x1]  ;;  %v2380_v23 = vld [vmem:[#allocation2 + $0x30] sm:$0xf]  ;;  %v2383_v24 = vld [vmem:[#allocation2 + $0x34] sm:$0x1] }
 0x210   : > { %v2314_v43 = vrot.slane %v2312_v35, 7 }
 0x211   : > { %v2296_v5 = vshrl.u32 %v5215_v39, 16  ;;  %v2299_v48 = vshll.u32 %v5215_v39, 16  ;;  %vm2194_vm15 = vcmp.ge.f32.partialorder %v2186_v40, 0.0  ;;  %v2202_v49 = vmul.f32 0.1, %v2186_v40 }
 0x212   : > { %v2317_v50 = vor.u32 %v2315_v44, %v2314_v43  ;;  %v2318_v52 = vrot.slane %v2314_v43, 4  ;;  %vm2192_vm0 = vcmp.ge.f32.partialorder %v2184_v41, 0.0  ;;  %v2200_v7 = vmul.f32 0.1, %v2184_v41  ;;  %v6770_v53 = vld [vmem:[#allocation2 + $0x8] sm:$0xf] }
 0x213   : > { %v2298_v54 = vrot.slane %v2296_v5, 7  ;;  %v2210_v55 = vsel %vm2194_vm15, %v2186_v40, %v2202_v49  ;;  %v6772_v57 = vld [vmem:[#allocation2 + $0xc] sm:$0x1]  ;;  %v2445_v19 = vshrl.u32 %v6770_v53, 16  ;;  %v2448_v22 = vshll.u32 %v6770_v53, 16 }
 0x214   : > { %v2387_v28 = vsel %vm6728_vm11, %v2317_v50, %v2386_v38  ;;  %v2390_v37 = vsel %vm6735_vm12, %v2318_v52, %v2389_v45  ;;  %v5218_v60 = vpack.c.bf16 %v2210_v55, %v2210_v55  ;;  %v2208_v61 = vsel %vm2192_vm0, %v2184_v41, %v2200_v7  ;;  %v6780_v2 = vld [vmem:[#allocation2 + $0x10] sm:$0xf]  ;;  %v6787_v11 = vld [vmem:[#allocation2 + $0x14] sm:$0x1]  ;;  %v6793_v18 = vld [vmem:[#allocation2 + $0x18] sm:$0xf] }
 0x215   : > { %2388 = vst [vmem:[#allocation2 + $0x38] sm:$0xf] %v2387_v28  ;;  %2391 = vst [vmem:[#allocation2 + $0x3c] sm:$0x1] %v2390_v37  ;;  %v2301_v62 = vor.u32 %v2299_v48, %v2298_v54  ;;  %v2302_v63 = vrot.slane %v2298_v54, 4  ;;  %v5216_v0 = vpack.c.bf16 %v2208_v61, %v2208_v61  ;;  %v2447_v1 = vrot.slane %v2445_v19, 4 }
 0x216   : > { %v2320_v6 = vshrl.u32 %v5218_v60, 16  ;;  %v2450_v9 = vrot.slane %v2448_v22, 5  ;;  %v2454_v10 = vshll.u32 %v6772_v57, 16  ;;  %v2323_v14 = vshll.u32 %v5218_v60, 16  ;;  %v6795_v30 = vld [vmem:[#allocation2 + $0x1c] sm:$0x1] }
 0x217   : > { %v2375_v12 = vsel %vm6728_vm11, %v2301_v62, %v2374_v58  ;;  %v2378_v13 = vsel %vm6735_vm12, %v2302_v63, %v2377_v59  ;;  %v2304_v17 = vshrl.u32 %v5216_v0, 16  ;;  %v2307_v21 = vshll.u32 %v5216_v0, 16  ;;  %v6811_v50 = vld [vmem:[#allocation2 + $0x20] sm:$0xf]  ;;  %v6813_v52 = vld [vmem:[#allocation2 + $0x24] sm:$0x1] }
 0x218   : > { %2376 = vst [vmem:[#allocation2 + $0x28] sm:$0xf] %v2375_v12  ;;  %2379 = vst [vmem:[#allocation2 + $0x2c] sm:$0x1] %v2378_v13  ;;  %v2322_v20 = vrot.slane %v2320_v6, 7  ;;  %v2451_v26 = vor.u32 %v2450_v9, %v2447_v1  ;;  %v2456_v27 = vrot.slane %v2454_v10, 5 }
 0x219   : > { %v2306_v29 = vrot.slane %v2304_v17, 7  ;;  %v2459_v31 = vshrl.u32 %v6780_v2, 16  ;;  %v2462_v32 = vshll.u32 %v6780_v2, 16  ;;  %v2468_v33 = vshll.u32 %v6787_v11, 16 }
 0x21a   : > { %v2325_v34 = vor.u32 %v2323_v14, %v2322_v20  ;;  %v2326_v35 = vrot.slane %v2322_v20, 4  ;;  %v2452_v36 = vrot.slane %v2451_v26, 4  ;;  %v2473_v38 = vshrl.u32 %v6793_v18, 16 }
 0x21b   : > { %v2309_v39 = vor.u32 %v2307_v21, %v2306_v29  ;;  %v2310_v40 = vrot.slane %v2306_v29, 4  ;;  %v2461_v41 = vrot.slane %v2459_v31, 4  ;;  %v2464_v43 = vrot.slane %v2462_v32, 5  ;;  %v2827_v31 = vld [vmem:[#allocation2 + $0x10] sm:$0xe] }
 0x21c   : > { %v2393_v44 = vsel %vm6728_vm11, %v2325_v34, %v2392_v15  ;;  %v2396_v45 = vsel %vm6735_vm12, %v2326_v35, %v2395_v16  ;;  %v2457_v47 = vsel %vm6389_vm2, %v2452_v36, %v2456_v27  ;;  %v2475_v7 = vrot.slane %v2473_v38, 4  ;;  %v6823_v60 = vld [vmem:[#allocation2 + $0x38] sm:$0xf]  ;;  %v6830_v1 = vld [vmem:[#allocation2 + $0x3c] sm:$0x1] }
 0x21d   : > { %2394 = vst [vmem:[#allocation2 + $0x40] sm:$0xf] %v2393_v44  ;;  %2397 = vst [vmem:[#allocation2 + $0x44] sm:$0x1] %v2396_v45  ;;  %v2381_v42 = vsel %vm6728_vm11, %v2309_v39, %v2380_v23  ;;  %v2384_v5 = vsel %vm6735_vm12, %v2310_v40, %v2383_v24  ;;  %v4951_v48 = vcombine.low %v2443_v8, %v2457_v47  ;;  %v2476_v54 = vshll.u32 %v6793_v18, 16  ;;  %v6170_v39 = vld [vmem:[%s7328_s3 + $0x8] sm:$0xff]  }
 0x21e   : > { %v2465_v49 = vor.u32 %v2464_v43, %v2461_v41  ;;  %2382 = vst [vmem:[#allocation2 + $0x30] sm:$0xf] %v2381_v42  ;;  %2385 = vst [vmem:[#allocation2 + $0x34] sm:$0x1] %v2384_v5  ;;  %v2482_v55 = vshll.u32 %v6795_v30, 16  ;;  %v2470_v51 = vrot.slane %v2468_v33, 5 }
 0x21f   : > { %5679 = vmatprep.mubr.bf16.mxu1 %v4951_v48  ;;  %v6817_v22 = vld [vmem:[#allocation2 + $0x28] sm:$0xf]  ;;  %v6819_v56 = vld [vmem:[#allocation2 + $0x2c] sm:$0x1]  ;;  %v2478_v28 = vrot.slane %v2476_v54, 5  ;;  %v2487_v58 = vshrl.u32 %v6811_v50, 16 }
 0x220   : > { %v2466_v19 = vrot.slane %v2465_v49, 4  ;;  %v2484_v37 = vrot.slane %v2482_v55, 5  ;;  %v2490_v59 = vshll.u32 %v6811_v50, 16  ;;  %v2496_v62 = vshll.u32 %v6813_v52, 16  ;;  %v2828_v36 = vld [vmem:[#allocation2 + $0x18] sm:$0xe] }
 0x221   : > { %v2501_v63 = vshrl.u32 %v6817_v22, 16  ;;  %v2504_v0 = vshll.u32 %v6817_v22, 16  ;;  %v2479_v6 = vor.u32 %v2478_v28, %v2475_v7  ;;  %v2489_v8 = vrot.slane %v2487_v58, 4  ;;  %v2829_v42 = vld [vmem:[#allocation2 + $0x20] sm:$0xe] }
 0x222   : > { %v2471_v61 = vsel %vm6389_vm2, %v2466_v19, %v2470_v51  ;;  %v2492_v9 = vrot.slane %v2490_v59, 5  ;;  %v2510_v10 = vshll.u32 %v6819_v56, 16  ;;  %v2498_v12 = vrot.slane %v2496_v62, 5  ;;  %v2830_v54 = vld [vmem:[#allocation2 + $0x28] sm:$0xe] }
 0x223   : > { %v2503_v13 = vrot.slane %v2501_v63, 4  ;;  %v2506_v14 = vrot.slane %v2504_v0, 5  ;;  %v2529_v15 = vshrl.u32 %v6823_v60, 16  ;;  %v2480_v16 = vrot.slane %v2479_v6, 4 }
 0x224   : > { %v2493_v17 = vor.u32 %v2492_v9, %v2489_v8  ;;  %v2512_v20 = vrot.slane %v2510_v10, 5  ;;  %v2532_v21 = vshll.u32 %v6823_v60, 16  ;;  %v2538_v29 = vshll.u32 %v6830_v1, 16  ;;  %v2832_v8 = vld [vmem:[#allocation2 + $0x38] sm:$0xe] }
 0x225   : > { %v2507_v23 = vor.u32 %v2506_v14, %v2503_v13  ;;  %v6835_v24 = vld [vmem:[#allocation2 + $0x30] sm:$0xf]  ;;  %v6837_v26 = vld [vmem:[#allocation2 + $0x34] sm:$0x1]  ;;  %v2531_v27 = vrot.slane %v2529_v15, 4  ;;  %v2485_v32 = vsel %vm6389_vm2, %v2480_v16, %v2484_v37  ;;  %v2862_v44 = vrot.slane %v6787_v11, 5 }
 0x226   : > { %v2494_v33 = vrot.slane %v2493_v17, 4  ;;  %v2515_v34 = vshrl.u32 %v6835_v24, 16  ;;  %v2518_v35 = vshll.u32 %v6835_v24, 16  ;;  %v4952_v38 = vcombine.low %v2471_v61, %v2485_v32  ;;  %v6171_v11 = vld [vmem:[%s7328_s3 + $0x10] sm:$0xff]   ;;  %v6173_v16 = vld [vmem:[%s7328_s3 + $0x18] sm:$0xff]  }
 0x227   : > { %v2508_v40 = vrot.slane %v2507_v23, 4  ;;  %v2524_v41 = vshll.u32 %v6837_v26, 16  ;;  %v2534_v43 = vrot.slane %v2532_v21, 5  ;;  %v2866_v5 = vrot.slane %v6795_v30, 5  ;;  %v6176_v32 = vld [vmem:[%s7328_s3 + $0x30] sm:$0xff]   ;;  %v6256_v30 = vld [vmem:[%s7114_s11 + $0x18] sm:$0xff]  }
 0x228   : > { %v2517_v45 = vrot.slane %v2515_v34, 4  ;;  %v2520_v47 = vrot.slane %v2518_v35, 5  ;;  %5680 = vmatmul.mubr.bf16.vlgmr.msra.gmra.mrb[0].mxu1 %v4952_v38  ;;  %v2499_v48 = vsel %vm6389_vm2, %v2494_v33, %v2498_v12  ;;  %v2540_v51 = vrot.slane %v2538_v29, 5  ;;  %v6177_v33 = vld [vmem:[%s7328_s3 + $0x38] sm:$0xff]   ;;  %v6179_v34 = vld [vmem:[%s7328_s3 + $0x80] sm:$0xff]  }
 0x229   : > { %v2513_v49 = vsel %vm6389_vm2, %v2508_v40, %v2512_v20  ;;  %v2535_v7 = vor.u32 %v2534_v43, %v2531_v27  ;;  %5688 = vmatpush3.bf16.msra.mxu1 %v6690_v3  ;;  %v4977_v28 = vrot.slane %v2827_v31, 9  ;;  %v2526_v37 = vrot.slane %v2524_v41, 5  ;;  %v2831_v3 = vld [vmem:[#allocation2 + $0x30] sm:$0xe]  ;;  %v6175_v31 = vld [vmem:[%s7328_s3 + $0x28] sm:$0xff]  }
 0x22a   : > { %v4953_v55 = vcombine.low %v2499_v48, %v2513_v49  ;;  %v2521_v19 = vor.u32 %v2520_v47, %v2517_v45  ;;  %5689 = vmatprep.subr.bf16.mxu1 %v6170_v39  ;;  %v4978_v59 = vrot.slane %v2828_v36, 9  ;;  %v4979_v61 = vrot.slane %v2829_v42, 9  ;;  %v2825_v35 = vld [vmem:[#allocation2] sm:$0xe]  ;;  %v2826_v36 = vld [vmem:[#allocation2 + $0x8] sm:$0xe] }
 0x22b   : > { %v2536_v58 = vrot.slane %v2535_v7, 4  ;;  %v6866_v63 = vsel %vm6860_vm4, %v4977_v28, %v2862_v44  ;;  %v2870_v0 = vrot.slane %v6813_v52, 5  ;;  %v4980_v6 = vrot.slane %v2830_v54, 9  ;;  %v6185_v47 = vld [vmem:[%s7328_s3 + $0xa0] sm:$0xff]   ;;  %v6188_v42 = vld [vmem:[%s7328_s3 + $0xb8] sm:$0xff]   ;;  %v6190_v48 = vld [vmem:[%s7328_s3 + $0xc8] sm:$0xff]  }
 0x22c   : > { %5683 = vmatprep.mubr.bf16.mxu1 %v4953_v55  ;;  %v2522_v62 = vrot.slane %v2521_v19, 4  ;;  %v6873_v10 = vsel %vm6860_vm4, %v4978_v59, %v2866_v5  ;;  %v2874_v14 = vrot.slane %v6819_v56, 5  ;;  %v4981_v15 = vrot.slane %v2831_v3, 9  ;;  %v6189_v5 = vld [vmem:[%s7328_s3 + $0xc0] sm:$0xff]   ;;  %v6191_v49 = vld [vmem:[%s7328_s3 + $0xd0] sm:$0xff]   ;;  %v6193_v7 = vld [vmem:[%s7328_s3 + $0xd8] sm:$0xff]  }
 0x22d   : > { %v2541_v9 = vsel %vm6389_vm2, %v2536_v58, %v2540_v51  ;;  %5690 = vmatpush3.bf16.msra.mxu1 %v6170_v39  ;;  %v5000_v13 = vcombine.low %v6866_v63, %v6873_v10  ;;  %v2878_v17 = vrot.slane %v6837_v26, 5  ;;  %v4982_v20 = vrot.slane %v2832_v8, 9  ;;  %v6181_v39 = vld [vmem:[%s7328_s3 + $0x88] sm:$0xff]   ;;  %v6194_v55 = vld [vmem:[%s7328_s3 + $0xe0] sm:$0xff]   ;;  %v3210_v19 = vld [vmem:[#allocation2 + $0x10] sm:$0xf] }
 0x22e   : > { %v2527_v12 = vsel %vm6389_vm2, %v2522_v62, %v2526_v37  ;;  %5691 = vmatprep.subr.bf16.mxu1 %v6171_v11  ;;  %v2882_v21 = vrot.slane %v6830_v1, 5  ;;  %v4963_v23 = vcombine.low %v6693_v4, %v6770_v53  ;;  %v6889_v27 = vsel %vm6860_vm4, %v4979_v61, %v2870_v0  ;;  %v6174_v53 = vld [vmem:[%s7328_s3 + $0x20] sm:$0xff]   ;;  %v6192_v54 = vld [vmem:[#allocation2 + $0x8] ss:$8 sps:$4 sm:$0xff]   ;;  %v6197_v59 = vld [vmem:[%s7328_s3 + $0xf8] sm:$0xff]  }
 0x22f   : > { %v4954_v52 = vcombine.low %v2527_v12, %v2541_v9  ;;  %v6893_v56 = vsel %vm6860_vm4, %v4980_v6, %v2874_v14  ;;  %v6899_v26 = vsel %vm6860_vm4, %v4981_v15, %v2878_v17  ;;  %v4964_v38 = vcombine.low %v6780_v2, %v6793_v18  ;;  %v6183_v2 = vld [vmem:[%s7328_s3 + $0x90] sm:$0xff]   ;;  %v3208_v28 = vld [vmem:[#allocation2 + $0x8] sm:$0xf]  ;;  %v6199_v0 = vld [vmem:[%s7328_s3 + $0x100] sm:$0xff]  }
 0x230   : > { %v5001_v29 = vcombine.low %v6889_v27, %v6893_v56  ;;  %v6903_v1 = vsel %vm6860_vm4, %v4982_v20, %v2882_v21  ;;  %v4965_v40 = vcombine.low %v6811_v50, %v6817_v22  ;;  %v2854_v41 = vrot.slane %v6719_v25, 5  ;;  %v6196_v51 = vld [vmem:[%s7328_s3 + $0xf0] sm:$0xff]   ;;  %v6993_v12 = vld [vmem:[#allocation2 + $0xc] sm:$0x1]  ;;  %v7003_v21 = vld [vmem:[%s7331_s6] sm:$0xff]  }
 0x231   : > { %5684 = vmatmul.mubr.bf16.gmra.mrb[4].mxu1 %v4954_v52  ;;  %v5002_v4 = vcombine.low %v6899_v26, %v6903_v1  ;;  %v2858_v43 = vrot.slane %v6772_v57, 5  ;;  %v4975_v44 = vrot.slane %v2825_v35, 9  ;;  %v4976_v45 = vrot.slane %v2826_v36, 9  ;;  %v6184_v57 = vld [vmem:[%s7328_s3 + $0x98] sm:$0xff]   ;;  %v6991_v9 = vld [vmem:[#allocation2 + $0x14] sm:$0x1]  ;;  %5879 = vmatprep.subr.bf16.mxu0 %v7003_v21 }
 0x232   : > { %5692 = vmatpush3.bf16.msra.mxu1 %v6171_v11  ;;  %5703 = vmatprep.mubr.bf16.mxu1 %v4963_v23  ;;  %v4966_v25 = vcombine.low %v6835_v24, %v6823_v60  ;;  %v6186_v60 = vld [vmem:[%s7328_s3 + $0xa8] sm:$0xff]   ;;  %v6187_v24 = vld [vmem:[%s7328_s3 + $0xb0] sm:$0xff]   ;;  %v3239_v37 = vshrl.u32 %v3210_v19, 16  ;;  %v3242_v58 = vshll.u32 %v3210_v19, 16  ;;  %v3225_v61 = vshrl.u32 %v3208_v28, 16 }
 0x233   : > { %5693 = vmatprep.subr.bf16.mxu1 %v6173_v16  ;;  %v2855_v18 = vsel %vm6860_vm4, %v4975_v44, %v2854_v41  ;;  %v2859_v50 = vsel %vm6860_vm4, %v4976_v45, %v2858_v43  ;;  %v6195_v11 = vld [vmem:[%s7328_s3 + $0xe8] sm:$0xff]   ;;  %v3228_v3 = vshll.u32 %v3208_v28, 16  ;;  %v3248_v52 = vshll.u32 %v6991_v9, 16  ;;  %v6203_v23 = vld [vmem:[%s7328_s3 + $0x110] sm:$0xff]   ;;  %5880 = vmatpush3.bf16.msra.mxu0 %v7003_v21  ;;  %v3212_v35 = vld [vmem:[#allocation2 + $0x18] sm:$0xf] }
 0x234   : > { %v4999_v22 = vcombine.low %v2855_v18, %v2859_v50  ;;  %v3241_v62 = vrot.slane %v3239_v37, 4  ;;  %v3244_v63 = vrot.slane %v3242_v58, 5  ;;  %v3227_v6 = vrot.slane %v3225_v61, 4  ;;  %v6201_v14 = vld [vmem:[%s7328_s3 + $0x108] sm:$0xff]   ;;  %v3218_v36 = vld [vmem:[#allocation2 + $0x30] sm:$0xf] }
 0x235   : > { %v3230_v8 = vrot.slane %v3228_v3, 5  ;;  %v3234_v17 = vshll.u32 %v6993_v12, 16  ;;  %v3250_v56 = vrot.slane %v3248_v52, 5  ;;  %v7036_v41 = vld [vmem:[%s7331_s6 + $0x18] sm:$0xff]   ;;  %v3216_v43 = vld [vmem:[#allocation2 + $0x28] sm:$0xf] }
 0x236   : > { %5694 = vmatpush3.bf16.msra.mxu1 %v6173_v16  ;;  %v3245_v10 = vor.u32 %v3244_v63, %v3241_v62  ;;  %v6200_v16 = vld [vmem:[#allocation2 + $0x28] ss:$8 sps:$4 sm:$0xff]   ;;  %v3253_v44 = vshrl.u32 %v3212_v35, 16  ;;  %v3256_v45 = vshll.u32 %v3212_v35, 16  ;;  %v3298_v18 = vshll.u32 %v3218_v36, 16 }
 0x237   : > { %5695 = vmatprep.subr.bf16.mxu1 %v6174_v53  ;;  %v3231_v15 = vor.u32 %v3230_v8, %v3227_v6  ;;  %v3236_v26 = vrot.slane %v3234_v17, 5  ;;  %v6206_v50 = vld [vmem:[%s7328_s3 + $0x128] sm:$0xff]  }
 0x238   : > { %v3246_v20 = vrot.slane %v3245_v10, 4  ;;  %v7060_v37 = vld [vmem:[%s7331_s6 + $0x28] sm:$0xff]  }
 0x239   : > { %v3232_v27 = vrot.slane %v3231_v15, 4  ;;  %v7066_v63 = vld [vmem:[#allocation2 + $0x2c] sm:$0x1] }
 0x23a   : > { %5696 = vmatpush3.bf16.msra.mxu1 %v6174_v53  ;;  %v3251_v1 = vsel %vm6389_vm2, %v3246_v20, %v3250_v56  ;;  %v3290_v20 = vshll.u32 %v7066_v63, 16 }
 0x23b   : > { %5697 = vmatprep.subr.bf16.mxu1 %v6175_v31  ;;  %v3237_v53 = vsel %vm6389_vm2, %v3232_v27, %v3236_v26 }
 0x23e   : > { %5698 = vmatpush3.bf16.msra.mxu1 %v6175_v31  ;;  %v6204_v31 = vld [vmem:[%s7328_s3 + $0x118] sm:$0xff]  }
 0x23f   : > { %5699 = vmatprep.subr.bf16.mxu1 %v6176_v32 }
 0x242   : > { %5700 = vmatpush3.bf16.msra.mxu1 %v6176_v32  ;;  %v5055_v32 = vcombine.low %v3237_v53, %v3251_v1 }
 0x243   : > { %5701 = vmatprep.subr.bf16.mxu1 %v6177_v33 }
 0x246   : > { %5702 = vmatpush3.bf16.msra.mxu1 %v6177_v33  ;;  %v3214_v33 = vld [vmem:[#allocation2 + $0x20] sm:$0xf] }
 0x247   : > { %5711 = vmatprep.subr.bf16.mxu1 %v6179_v34 }
 0x249   : > { %5704 = vmatmul.mubr.bf16.vlgmr.msra.gmra.mrb[0].mxu1 %v4964_v38  ;;  %v6205_v38 = vld [vmem:[%s7328_s3 + $0x120] sm:$0xff]  }
 0x24a   : > { %5707 = vmatprep.mubr.bf16.mxu1 %v4965_v40  ;;  %5712 = vmatpush3.bf16.msra.mxu1 %v6179_v34  ;;  %v7027_v34 = vld [vmem:[%s7331_s6 + $0x10] sm:$0xff]   ;;  %v3270_v40 = vshll.u32 %v3214_v33, 16 }
 0x24b   : > { %5713 = vmatprep.subr.bf16.mxu1 %v6181_v39 }
 0x24e   : > { %5714 = vmatpush3.bf16.msra.mxu1 %v6181_v39  ;;  %v3267_v39 = vshrl.u32 %v3214_v33, 16 }
 0x24f   : > { %5715 = vmatprep.subr.bf16.mxu1 %v6183_v2 }
 0x251   : > { %5708 = vmatmul.mubr.bf16.gmra.mrb[4].mxu1 %v4966_v25  ;;  %v3269_v25 = vrot.slane %v3267_v39, 4 }
 0x252   : > { %5716 = vmatpush3.bf16.msra.mxu1 %v6183_v2  ;;  %5727 = vmatprep.mubr.bf16.mxu1 %v4999_v22  ;;  %v3295_v2 = vshrl.u32 %v3218_v36, 16  ;;  %v3281_v22 = vshrl.u32 %v3216_v43, 16 }
 0x253   : > { %5717 = vmatprep.subr.bf16.mxu1 %v6184_v57 }
 0x256   : > { %5718 = vmatpush3.bf16.msra.mxu1 %v6184_v57  ;;  %v3272_v57 = vrot.slane %v3270_v40, 5  ;;  %v7095_v40 = vld [vmem:[%s7331_s6 + $0x38] sm:$0xff]  }
 0x257   : > { %5719 = vmatprep.subr.bf16.mxu1 %v6185_v47 }
 0x258   : > { %v3273_v19 = vor.u32 %v3272_v57, %v3269_v25 }
 0x25a   : > { %5720 = vmatpush3.bf16.msra.mxu1 %v6185_v47  ;;  %v3284_v47 = vshll.u32 %v3216_v43, 16 }
 0x25b   : > { %5721 = vmatprep.subr.bf16.mxu1 %v6186_v60 }
 0x25c   : > { %v3286_v28 = vrot.slane %v3284_v47, 5  ;;  %v6210_v47 = vld [vmem:[%s7328_s3 + $0x148] sm:$0xff]  }
 0x25e   : > { %5722 = vmatpush3.bf16.msra.mxu1 %v6186_v60  ;;  %v7046_v60 = vld [vmem:[%s7331_s6 + $0x20] sm:$0xff]  }
 0x25f   : > { %5723 = vmatprep.subr.bf16.mxu1 %v6187_v24 }
 0x262   : > { %5724 = vmatpush3.bf16.msra.mxu1 %v6187_v24  ;;  %v7048_v24 = vld [vmem:[#allocation2 + $0x24] sm:$0x1] }
 0x263   : > { %5725 = vmatprep.subr.bf16.mxu1 %v6188_v42  ;;  %v3276_v58 = vshll.u32 %v7048_v24, 16 }
 0x265   : > { %v3278_v17 = vrot.slane %v3276_v58, 5  ;;  %v3516_v58 = vrot.slane %v6993_v12, 5  ;;  %v6212_v12 = vld [vmem:[%s7328_s3 + $0x158] sm:$0xff]  }
 0x266   : > { %5726 = vmatpush3.bf16.msra.mxu1 %v6188_v42  ;;  %v3255_v42 = vrot.slane %v3253_v44, 4  ;;  %v3491_v44 = vld [vmem:[#allocation2 + $0x10] sm:$0xe] }
 0x267   : > { %5735 = vmatprep.subr.bf16.mxu1 %v6189_v5 }
 0x269   : > { %5728 = vmatmul.mubr.bf16.vlgmr.msra.gmra.mrb[0].mxu1 %v5000_v13  ;;  %v6198_v13 = vld [vmem:[#allocation2 + $0x18] ss:$8 sps:$4 sm:$0xff]  }
 0x26a   : > { %5731 = vmatprep.mubr.bf16.mxu1 %v5001_v29  ;;  %5736 = vmatpush3.bf16.msra.mxu1 %v6189_v5  ;;  %v7012_v29 = vld [vmem:[%s7331_s6 + $0x8] sm:$0xff]   ;;  %v3258_v5 = vrot.slane %v3256_v45, 5 }
 0x26b   : > { %5737 = vmatprep.subr.bf16.mxu1 %v6190_v48  ;;  %5881 = vmatprep.subr.bf16.mxu0 %v7012_v29 }
 0x26c   : > { %5882 = vmatpush3.bf16.msra.mxu0 %v7012_v29  ;;  %v3259_v62 = vor.u32 %v3258_v5, %v3255_v42  ;;  %v3490_v5 = vld [vmem:[#allocation2 + $0x8] sm:$0xe] }
 0x26d   : > { %5883 = vmatprep.subr.bf16.mxu0 %v7027_v34 }
 0x26e   : > { %5738 = vmatpush3.bf16.msra.mxu1 %v6190_v48  ;;  %v3297_v48 = vrot.slane %v3295_v2, 4  ;;  %v3260_v26 = vrot.slane %v3259_v62, 4  ;;  %v3292_v2 = vrot.slane %v3290_v20, 5  ;;  %v6216_v20 = vld [vmem:[%s7328_s3 + $0x178] sm:$0xff]  }
 0x26f   : > { %5739 = vmatprep.subr.bf16.mxu1 %v6191_v49 }
 0x270   : > { %5884 = vmatpush3.bf16.msra.mxu0 %v7027_v34 }
 0x271   : > { %5732 = vmatmul.mubr.bf16.gmra.mrb[4].mxu1 %v5002_v4  ;;  %v6202_v4 = vld [vmem:[#allocation2 + $0x38] ss:$8 sps:$4 sm:$0xff]   ;;  %5885 = vmatprep.subr.bf16.mxu0 %v7036_v41 }
 0x272   : > { %5740 = vmatpush3.bf16.msra.mxu1 %v6191_v49  ;;  %5751 = vmatprep.mubr.bf16.mxu1 %v6192_v54  ;;  %v3300_v49 = vrot.slane %v3298_v18, 5  ;;  %v3220_v54 = vld [vmem:[#allocation2 + $0x38] sm:$0xf] }
 0x273   : > { %5741 = vmatprep.subr.bf16.mxu1 %v6193_v7  ;;  %v3309_v6 = vshrl.u32 %v3220_v54, 16  ;;  %v3312_v8 = vshll.u32 %v3220_v54, 16 }
 0x274   : > { %5886 = vmatpush3.bf16.msra.mxu0 %v7036_v41 }
 0x275   : > { %5887 = vmatprep.subr.bf16.mxu0 %v7046_v60  ;;  %v3314_v53 = vrot.slane %v3312_v8, 5 }
 0x276   : > { %5742 = vmatpush3.bf16.msra.mxu1 %v6193_v7  ;;  %v3222_v7 = vld [vmem:[#allocation2 + $0x40] sm:$0xf] }
 0x277   : > { %5743 = vmatprep.subr.bf16.mxu1 %v6194_v55  ;;  %v3323_v61 = vshrl.u32 %v3222_v7, 16  ;;  %v3326_v3 = vshll.u32 %v3222_v7, 16 }
 0x278   : > { %5888 = vmatpush3.bf16.msra.mxu0 %v7046_v60 }
 0x279   : > { %5889 = vmatprep.subr.bf16.mxu0 %v7060_v37  ;;  %v3325_v27 = vrot.slane %v3323_v61, 4  ;;  %v3328_v56 = vrot.slane %v3326_v3, 5 }
 0x27a   : > { %5744 = vmatpush3.bf16.msra.mxu1 %v6194_v55  ;;  %v6207_v55 = vld [vmem:[%s7328_s3 + $0x130] sm:$0xff]  }
 0x27b   : > { %5745 = vmatprep.subr.bf16.mxu1 %v6195_v11  ;;  %v3329_v43 = vor.u32 %v3328_v56, %v3325_v27  ;;  %v3492_v27 = vld [vmem:[#allocation2 + $0x18] sm:$0xe] }
 0x27c   : > { %5890 = vmatpush3.bf16.msra.mxu0 %v7060_v37 }
 0x27d   : > { %v3330_v54 = vrot.slane %v3329_v43, 4  ;;  %v3497_v43 = vld [vmem:[#allocation2 + $0x40] sm:$0xe] }
 0x27e   : > { %5746 = vmatpush3.bf16.msra.mxu1 %v6195_v11  ;;  %v7055_v11 = vld [vmem:[#allocation2 + $0x1c] sm:$0x1] }
 0x27f   : > { %5747 = vmatprep.subr.bf16.mxu1 %v6196_v51  ;;  %v3262_v10 = vshll.u32 %v7055_v11, 16 }
 0x282   : > { %5748 = vmatpush3.bf16.msra.mxu1 %v6196_v51  ;;  %v3283_v51 = vrot.slane %v3281_v22, 4 }
 0x283   : > { %5749 = vmatprep.subr.bf16.mxu1 %v6197_v59 }
 0x284   : > { %v3287_v15 = vor.u32 %v3286_v28, %v3283_v51  ;;  %v6254_v51 = vld [vmem:[%s7114_s11 + $0x8] sm:$0xff]   ;;  %v5067_v28 = vrot.slane %v3490_v5, 9 }
 0x286   : > { %5750 = vmatpush3.bf16.msra.mxu1 %v6197_v59  ;;  %v7063_v59 = vld [vmem:[#allocation2 + $0x34] sm:$0x1]  ;;  %v3288_v35 = vrot.slane %v3287_v15, 4  ;;  %v3517_v8 = vsel %vm6860_vm4, %v5067_v28, %v3516_v58 }
 0x287   : > { %5759 = vmatprep.subr.bf16.mxu1 %v6199_v0  ;;  %v3304_v52 = vshll.u32 %v7063_v59, 16  ;;  %v6215_v15 = vld [vmem:[%s7328_s3 + $0x170] sm:$0xff]  }
 0x288   : > { %v3293_v22 = vsel %vm6389_vm2, %v3288_v35, %v3292_v2 }
 0x289   : > { %5752 = vmatmul.mubr.bf16.vlgmr.msra.gmra.mrb[0].mxu1 %v6198_v13  ;;  %v6208_v13 = vld [vmem:[%s7328_s3 + $0x138] sm:$0xff]   ;;  %v3306_v36 = vrot.slane %v3304_v52, 5  ;;  %v3493_v52 = vld [vmem:[#allocation2 + $0x20] sm:$0xe] }
 0x28a   : > { %5755 = vmatprep.mubr.bf16.mxu1 %v6200_v16  ;;  %5760 = vmatpush3.bf16.msra.mxu1 %v6199_v0  ;;  %v3301_v0 = vor.u32 %v3300_v49, %v3297_v48  ;;  %v7077_v16 = vld [vmem:[%s7331_s6 + $0x30] sm:$0xff]   ;;  %v5068_v48 = vrot.slane %v3491_v44, 9  ;;  %v3520_v49 = vrot.slane %v6991_v9, 5  ;;  %v5070_v56 = vrot.slane %v3493_v52, 9 }
 0x28b   : > { %5761 = vmatprep.subr.bf16.mxu1 %v6201_v14  ;;  %5891 = vmatprep.subr.bf16.mxu0 %v7077_v16  ;;  %v6211_v9 = vld [vmem:[%s7328_s3 + $0x150] sm:$0xff]  }
 0x28c   : > { %v3302_v1 = vrot.slane %v3301_v0, 4  ;;  %5892 = vmatpush3.bf16.msra.mxu0 %v7077_v16  ;;  %v3521_v62 = vsel %vm6860_vm4, %v5068_v48, %v3520_v49  ;;  %v6220_v48 = vld [vmem:[#allocation2 + $0x10] ss:$8 sps:$4 sm:$0xff]   ;;  %v6223_v49 = vld [vmem:[%s7328_s3 + $0x1a8] sm:$0xff]  }
 0x28d   : > { %5893 = vmatprep.subr.bf16.mxu0 %v7095_v40 }
 0x28e   : > { %5762 = vmatpush3.bf16.msra.mxu1 %v6201_v14  ;;  %v3274_v14 = vrot.slane %v3273_v19, 4  ;;  %v3307_v18 = vsel %vm6389_vm2, %v3302_v1, %v3306_v36  ;;  %v3494_v1 = vld [vmem:[#allocation2 + $0x28] sm:$0xe]  ;;  %v3532_v36 = vrot.slane %v7066_v63, 5 }
 0x28f   : > { %5763 = vmatprep.subr.bf16.mxu1 %v6203_v23  ;;  %v5057_v7 = vcombine.low %v3293_v22, %v3307_v18  ;;  %v5071_v35 = vrot.slane %v3494_v1, 9  ;;  %v6218_v63 = vld [vmem:[%s7328_s3 + $0x188] sm:$0xff]   ;;  %v5074_v18 = vrot.slane %v3497_v43, 9  ;;  %v6219_v22 = vld [vmem:[%s7328_s3 + $0x190] sm:$0xff]   ;;  %v3875_v43 = vld [vmem:[#allocation2 + $0x20] sm:$0xf] }
 0x290   : > { %v3279_v33 = vsel %vm6389_vm2, %v3274_v14, %v3278_v17  ;;  %5894 = vmatpush3.bf16.msra.mxu0 %v7095_v40  ;;  %v6214_v14 = vld [vmem:[%s7328_s3 + $0x168] sm:$0xff]   ;;  %v3495_v17 = vld [vmem:[#allocation2 + $0x30] sm:$0xe] }
 0x291   : > { %5756 = vmatmul.mubr.bf16.gmra.mrb[4].mxu1 %v6202_v4  ;;  %v3311_v4 = vrot.slane %v3309_v6, 4  ;;  %v3533_v44 = vsel %vm6860_vm4, %v5071_v35, %v3532_v36  ;;  %v3877_v36 = vld [vmem:[#allocation2 + $0x28] sm:$0xf] }
 0x292   : > { %5764 = vmatpush3.bf16.msra.mxu1 %v6203_v23  ;;  %5775 = vmatprep.mubr.bf16.mxu1 %v5055_v32  ;;  %v7080_v23 = vld [vmem:[#allocation2 + $0x44] sm:$0x1] }
 0x293   : > { %5765 = vmatprep.subr.bf16.mxu1 %v6204_v31  ;;  %v6209_v32 = vld [vmem:[%s7328_s3 + $0x140] sm:$0xff]   ;;  %v3332_v39 = vshll.u32 %v7080_v23, 16 }
 0x295   : > { %v3334_v42 = vrot.slane %v3332_v39, 5 }
 0x296   : > { %5766 = vmatpush3.bf16.msra.mxu1 %v6204_v31  ;;  %v3264_v31 = vrot.slane %v3262_v10, 5  ;;  %v5091_v10 = vcombine.low %v3517_v8, %v3521_v62  ;;  %v6227_v62 = vld [vmem:[%s7328_s3 + $0x1c0] sm:$0xff]   ;;  %v7191_v8 = vld [vmem:[#allocation2 + $0x14] sm:$0x1] }
 0x297   : > { %5767 = vmatprep.subr.bf16.mxu1 %v6205_v38  ;;  %v3335_v3 = vsel %vm6389_vm2, %v3330_v54, %v3334_v42  ;;  %v6224_v54 = vld [vmem:[%s7328_s3 + $0x1b0] sm:$0xff]  }
 0x298   : > { %v3265_v45 = vsel %vm6389_vm2, %v3260_v26, %v3264_v31  ;;  %v3528_v26 = vrot.slane %v7048_v24, 5  ;;  %v5069_v31 = vrot.slane %v3492_v27, 9 }
 0x299   : > { %v5056_v25 = vcombine.low %v3265_v45, %v3279_v33  ;;  %v6217_v33 = vld [vmem:[%s7328_s3 + $0x180] sm:$0xff]   ;;  %v3496_v45 = vld [vmem:[#allocation2 + $0x38] sm:$0xe] }
 0x29a   : > { %5768 = vmatpush3.bf16.msra.mxu1 %v6205_v38  ;;  %v7089_v38 = vld [vmem:[#allocation2 + $0x3c] sm:$0x1]  ;;  %v3529_v39 = vsel %vm6860_vm4, %v5070_v56, %v3528_v26  ;;  %v6231_v56 = vld [vmem:[%s7328_s3 + $0x1d0] sm:$0xff]  }
 0x29b   : > { %5769 = vmatprep.subr.bf16.mxu1 %v6206_v50  ;;  %v3318_v57 = vshll.u32 %v7089_v38, 16 }
 0x29d   : > { %v3320_v61 = vrot.slane %v3318_v57, 5  ;;  %v3540_v57 = vrot.slane %v7089_v38, 5  ;;  %v6222_v38 = vld [vmem:[%s7328_s3 + $0x1a0] sm:$0xff]  }
 0x29e   : > { %5770 = vmatpush3.bf16.msra.mxu1 %v6206_v50  ;;  %v3315_v50 = vor.u32 %v3314_v53, %v3311_v4  ;;  %v5072_v4 = vrot.slane %v3495_v17, 9  ;;  %v3536_v53 = vrot.slane %v7063_v59, 5  ;;  %v6228_v17 = vld [vmem:[#allocation2 + $0x30] ss:$8 sps:$4 sm:$0xff]  }
 0x29f   : > { %5771 = vmatprep.subr.bf16.mxu1 %v6207_v55 }
 0x2a0   : > { %v3316_v19 = vrot.slane %v3315_v50, 4  ;;  %v3537_v24 = vsel %vm6860_vm4, %v5072_v4, %v3536_v53  ;;  %v3544_v50 = vrot.slane %v7080_v23, 5  ;;  %v6221_v23 = vld [vmem:[%s7328_s3 + $0x198] sm:$0xff]  }
 0x2a1   : > { %v5093_v2 = vcombine.low %v3533_v44, %v3537_v24  ;;  %v6233_v24 = vld [vmem:[%s7328_s3 + $0x1e0] sm:$0xff]   ;;  %v3881_v44 = vld [vmem:[#allocation2 + $0x38] sm:$0xf] }
 0x2a2   : > { %5772 = vmatpush3.bf16.msra.mxu1 %v6207_v55  ;;  %v6253_v55 = vld [vmem:[%s7114_s11] sm:$0xff]   ;;  %v3321_v0 = vsel %vm6389_vm2, %v3316_v19, %v3320_v61 }
 0x2a3   : > { %5773 = vmatprep.subr.bf16.mxu1 %v6208_v13  ;;  %5895 = vmatprep.mubr.bf16.mxu0 %v6253_v55  ;;  %v5058_v6 = vcombine.low %v3321_v0, %v3335_v3  ;;  %v3873_v55 = vld [vmem:[#allocation2 + $0x18] sm:$0xf] }
 0x2a4   : > { %5896 = vmatmul.mubr.bf16.vlgmr.msra.gmra.mrb[8].mxu0 %v6254_v51  ;;  %v3902_v28 = vshrl.u32 %v3873_v55, 16  ;;  %v3905_v58 = vshll.u32 %v3873_v55, 16  ;;  %v7219_v55 = vld [vmem:[#allocation2 + $0x2c] sm:$0x1] }
 0x2a6   : > { %5774 = vmatpush3.bf16.msra.mxu1 %v6208_v13  ;;  %v6213_v13 = vld [vmem:[%s7328_s3 + $0x160] sm:$0xff]   ;;  %v3904_v0 = vrot.slane %v3902_v28, 4 }
 0x2a7   : > { %5783 = vmatprep.subr.bf16.mxu1 %v6209_v32 }
 0x2a9   : > { %5776 = vmatmul.mubr.bf16.vlgmr.msra.gmra.mrb[0].mxu1 %v5056_v25  ;;  %v5073_v25 = vrot.slane %v3496_v45, 9 }
 0x2aa   : > { %5779 = vmatprep.mubr.bf16.mxu1 %v5057_v7  ;;  %5784 = vmatpush3.bf16.msra.mxu1 %v6209_v32  ;;  %v3524_v32 = vrot.slane %v7055_v11, 5  ;;  %v3871_v7 = vld [vmem:[#allocation2 + $0x10] sm:$0xf] }
 0x2ab   : > { %5785 = vmatprep.subr.bf16.mxu1 %v6210_v47  ;;  %v3541_v42 = vsel %vm6860_vm4, %v5073_v25, %v3540_v57  ;;  %v3888_v19 = vshrl.u32 %v3871_v7, 16  ;;  %v3891_v51 = vshll.u32 %v3871_v7, 16  ;;  %v3958_v25 = vshrl.u32 %v3881_v44, 16 }
 0x2ac   : > { %v3525_v59 = vsel %vm6860_vm4, %v5069_v31, %v3524_v32  ;;  %v6230_v31 = vld [vmem:[#allocation2 + $0x40] ss:$8 sps:$4 sm:$0xff]   ;;  %v3961_v57 = vshll.u32 %v3881_v44, 16 }
 0x2ad   : > { %v5092_v11 = vcombine.low %v3525_v59, %v3529_v39  ;;  %v3890_v61 = vrot.slane %v3888_v19, 4  ;;  %v3893_v3 = vrot.slane %v3891_v51, 5  ;;  %v3879_v39 = vld [vmem:[#allocation2 + $0x30] sm:$0xf]  ;;  %v3930_v59 = vshrl.u32 %v3877_v36, 16 }
 0x2ae   : > { %5786 = vmatpush3.bf16.msra.mxu1 %v6210_v47  ;;  %v3545_v47 = vsel %vm6860_vm4, %v5074_v18, %v3544_v50  ;;  %v3947_v45 = vshll.u32 %v3879_v39, 16  ;;  %v3919_v18 = vshll.u32 %v3875_v43, 16  ;;  %v6234_v50 = vld [vmem:[%s7328_s3 + $0x1e8] sm:$0xff]   ;;  %v3960_v19 = vrot.slane %v3958_v25, 4  ;;  %v4153_v25 = vld [vmem:[#allocation2 + $0x10] sm:$0xe] }
 0x2af   : > { %5787 = vmatprep.subr.bf16.mxu1 %v6211_v9  ;;  %v5094_v5 = vcombine.low %v3541_v42, %v3545_v47  ;;  %v3932_v47 = vrot.slane %v3930_v59, 4  ;;  %v3963_v51 = vrot.slane %v3961_v57, 5 }
 0x2b1   : > { %5780 = vmatmul.mubr.bf16.gmra.mrb[4].mxu1 %v5058_v6  ;;  %v3907_v6 = vrot.slane %v3905_v58, 5  ;;  %v7221_v58 = vld [vmem:[#allocation2 + $0x34] sm:$0x1] }
 0x2b2   : > { %5788 = vmatpush3.bf16.msra.mxu1 %v6211_v9  ;;  %5799 = vmatprep.mubr.bf16.mxu1 %v5091_v10  ;;  %v6225_v9 = vld [vmem:[%s7328_s3 + $0x1b8] sm:$0xff]  }
 0x2b3   : > { %5789 = vmatprep.subr.bf16.mxu1 %v6212_v12  ;;  %v7193_v10 = vld [vmem:[#allocation2 + $0x1c] sm:$0x1]  ;;  %v3908_v52 = vor.u32 %v3907_v6, %v3904_v0 }
 0x2b4   : > { %v3911_v27 = vshll.u32 %v7193_v10, 16 }
 0x2b5   : > { %v3909_v1 = vrot.slane %v3908_v52, 4  ;;  %v3964_v52 = vor.u32 %v3963_v51, %v3960_v19  ;;  %v6241_v19 = vld [vmem:[%s7328_s3 + $0x210] sm:$0xff]  }
 0x2b6   : > { %5790 = vmatpush3.bf16.msra.mxu1 %v6212_v12  ;;  %v3894_v12 = vor.u32 %v3893_v3, %v3890_v61  ;;  %v3913_v53 = vrot.slane %v3911_v27, 5 }
 0x2b7   : > { %5791 = vmatprep.subr.bf16.mxu1 %v6213_v13 }
 0x2b8   : > { %v3914_v32 = vsel %vm6389_vm2, %v3909_v1, %v3913_v53 }
 0x2ba   : > { %5792 = vmatpush3.bf16.msra.mxu1 %v6213_v13  ;;  %v6226_v13 = vld [vmem:[#allocation2 + $0x20] ss:$8 sps:$4 sm:$0xff]  }
 0x2bb   : > { %5793 = vmatprep.subr.bf16.mxu1 %v6214_v14 }
 0x2be   : > { %5794 = vmatpush3.bf16.msra.mxu1 %v6214_v14  ;;  %v6229_v14 = vld [vmem:[%s7328_s3 + $0x1c8] sm:$0xff]  }
 0x2bf   : > { %5795 = vmatprep.subr.bf16.mxu1 %v6215_v15 }
 0x2c2   : > { %5796 = vmatpush3.bf16.msra.mxu1 %v6215_v15  ;;  %v3897_v15 = vshll.u32 %v7191_v8, 16 }
 0x2c3   : > { %5797 = vmatprep.subr.bf16.mxu1 %v6216_v20 }
 0x2c4   : > { %v3899_v26 = vrot.slane %v3897_v15, 5  ;;  %v3953_v15 = vshll.u32 %v7221_v58, 16 }
 0x2c6   : > { %5798 = vmatpush3.bf16.msra.mxu1 %v6216_v20  ;;  %v3895_v20 = vrot.slane %v3894_v12, 4  ;;  %v3939_v12 = vshll.u32 %v7219_v55, 16 }
 0x2c7   : > { %5807 = vmatprep.subr.bf16.mxu1 %v6217_v33 }
 0x2c8   : > { %v3900_v4 = vsel %vm6389_vm2, %v3895_v20, %v3899_v26 }
 0x2c9   : > { %5800 = vmatmul.mubr.bf16.vlgmr.msra.gmra.mrb[0].mxu1 %v5092_v11  ;;  %v5147_v35 = vcombine.low %v3900_v4, %v3914_v32  ;;  %v3933_v11 = vshll.u32 %v3877_v36, 16  ;;  %v3941_v32 = vrot.slane %v3939_v12, 5  ;;  %v3955_v36 = vrot.slane %v3953_v15, 5  ;;  %v6247_v12 = vld [vmem:[%s7328_s3 + $0x228] sm:$0xff]  }
 0x2ca   : > { %5803 = vmatprep.mubr.bf16.mxu1 %v5093_v2  ;;  %5808 = vmatpush3.bf16.msra.mxu1 %v6217_v33  ;;  %v6232_v33 = vld [vmem:[%s7328_s3 + $0x1d8] sm:$0xff]   ;;  %v3916_v2 = vshrl.u32 %v3875_v43, 16  ;;  %v4156_v15 = vld [vmem:[#allocation2 + $0x28] sm:$0xe] }
 0x2cb   : > { %5809 = vmatprep.subr.bf16.mxu1 %v6218_v63  ;;  %v3935_v42 = vrot.slane %v3933_v11, 5 }
 0x2cd   : > { %v3936_v28 = vor.u32 %v3935_v42, %v3932_v47  ;;  %v6239_v47 = vld [vmem:[%s7328_s3 + $0x208] sm:$0xff]  }
 0x2ce   : > { %5810 = vmatpush3.bf16.msra.mxu1 %v6218_v63  ;;  %v3944_v63 = vshrl.u32 %v3879_v39, 16  ;;  %v3965_v39 = vrot.slane %v3964_v52, 4  ;;  %v4157_v52 = vld [vmem:[#allocation2 + $0x30] sm:$0xe] }
 0x2cf   : > { %5811 = vmatprep.subr.bf16.mxu1 %v6219_v22 }
 0x2d1   : > { %5804 = vmatmul.mubr.bf16.gmra.mrb[4].mxu1 %v5094_v5  ;;  %v3946_v5 = vrot.slane %v3944_v63, 4 }
 0x2d2   : > { %5812 = vmatpush3.bf16.msra.mxu1 %v6219_v22  ;;  %5823 = vmatprep.mubr.bf16.mxu1 %v6220_v48  ;;  %v3885_v22 = vld [vmem:[#allocation2 + $0x48] sm:$0xf]  ;;  %v3883_v48 = vld [vmem:[#allocation2 + $0x40] sm:$0xf] }
 0x2d3   : > { %5813 = vmatprep.subr.bf16.mxu1 %v6221_v23  ;;  %v3986_v7 = vshrl.u32 %v3885_v22, 16  ;;  %v3972_v61 = vshrl.u32 %v3883_v48, 16  ;;  %v3975_v3 = vshll.u32 %v3883_v48, 16 }
 0x2d5   : > { %v3974_v26 = vrot.slane %v3972_v61, 4  ;;  %v3977_v1 = vrot.slane %v3975_v3, 5 }
 0x2d6   : > { %5814 = vmatpush3.bf16.msra.mxu1 %v6221_v23  ;;  %v3949_v23 = vrot.slane %v3947_v45, 5 }
 0x2d7   : > { %5815 = vmatprep.subr.bf16.mxu1 %v6222_v38  ;;  %v3978_v44 = vor.u32 %v3977_v1, %v3974_v26  ;;  %v4158_v26 = vld [vmem:[#allocation2 + $0x38] sm:$0xe]  ;;  %v5163_v1 = vrot.slane %v4157_v52, 9 }
 0x2d8   : > { %v3950_v0 = vor.u32 %v3949_v23, %v3946_v5 }
 0x2d9   : > { %v3979_v5 = vrot.slane %v3978_v44, 4 }
 0x2da   : > { %5816 = vmatpush3.bf16.msra.mxu1 %v6222_v38  ;;  %v3918_v38 = vrot.slane %v3916_v2, 4  ;;  %v3951_v4 = vrot.slane %v3950_v0, 4 }
 0x2db   : > { %5817 = vmatprep.subr.bf16.mxu1 %v6223_v49 }
 0x2dc   : > { %v3956_v45 = vsel %vm6389_vm2, %v3951_v4, %v3955_v36  ;;  %v4195_v4 = vrot.slane %v7221_v58, 5 }
 0x2de   : > { %5818 = vmatpush3.bf16.msra.mxu1 %v6223_v49  ;;  %v3921_v49 = vrot.slane %v3919_v18, 5 }
 0x2df   : > { %5819 = vmatprep.subr.bf16.mxu1 %v6224_v54 }
 0x2e0   : > { %v3922_v6 = vor.u32 %v3921_v49, %v3918_v38  ;;  %v4154_v38 = vld [vmem:[#allocation2 + $0x18] sm:$0xe]  ;;  %v5159_v49 = vrot.slane %v4153_v25, 9 }
 0x2e1   : > { %v5160_v51 = vrot.slane %v4154_v38, 9 }
 0x2e2   : > { %5820 = vmatpush3.bf16.msra.mxu1 %v6224_v54  ;;  %v6235_v54 = vld [vmem:[%s7328_s3 + $0x1f0] sm:$0xff]  }
 0x2e3   : > { %5821 = vmatprep.subr.bf16.mxu1 %v6225_v9 }
 0x2e6   : > { %5822 = vmatpush3.bf16.msra.mxu1 %v6225_v9  ;;  %v3989_v9 = vshll.u32 %v3885_v22, 16 }
 0x2e7   : > { %5831 = vmatprep.subr.bf16.mxu1 %v6227_v62 }
 0x2e8   : > { %v3991_v20 = vrot.slane %v3989_v9, 5  ;;  %v4183_v9 = vrot.slane %v7193_v10, 5 }
 0x2e9   : > { %5824 = vmatmul.mubr.bf16.vlgmr.msra.gmra.mrb[0].mxu1 %v6226_v13  ;;  %v7226_v13 = vld [vmem:[#allocation2 + $0x3c] sm:$0x1] }
 0x2ea   : > { %5827 = vmatprep.mubr.bf16.mxu1 %v6228_v17  ;;  %5832 = vmatpush3.bf16.msra.mxu1 %v6227_v62  ;;  %v7223_v62 = vld [vmem:[#allocation2 + $0x24] sm:$0x1]  ;;  %v3988_v17 = vrot.slane %v3986_v7, 4  ;;  %v3967_v53 = vshll.u32 %v7226_v13, 16  ;;  %v4179_v7 = vrot.slane %v7191_v8, 5  ;;  %v4184_v0 = vsel %vm6860_vm4, %v5160_v51, %v4183_v9 }
 0x2eb   : > { %5833 = vmatprep.subr.bf16.mxu1 %v6229_v14  ;;  %v3925_v27 = vshll.u32 %v7223_v62, 16 }
 0x2ec   : > { %v3992_v43 = vor.u32 %v3991_v20, %v3988_v17  ;;  %v3969_v2 = vrot.slane %v3967_v53, 5  ;;  %v4180_v8 = vsel %vm6860_vm4, %v5159_v49, %v4179_v7  ;;  %v6251_v17 = vld [vmem:[%s7328_s3 + $0x238] sm:$0xff]   ;;  %v4155_v20 = vld [vmem:[#allocation2 + $0x20] sm:$0xe] }
 0x2ed   : > { %v3927_v59 = vrot.slane %v3925_v27, 5  ;;  %v5183_v10 = vcombine.low %v4180_v8, %v4184_v0  ;;  %v5162_v27 = vrot.slane %v4156_v15, 9  ;;  %v5161_v53 = vrot.slane %v4155_v20, 9 }
 0x2ee   : > { %5834 = vmatpush3.bf16.msra.mxu1 %v6229_v14  ;;  %v6236_v14 = vld [vmem:[%s7328_s3 + $0x1f8] sm:$0xff]   ;;  %v3970_v22 = vsel %vm6389_vm2, %v3965_v39, %v3969_v2  ;;  %v3993_v23 = vrot.slane %v3992_v43, 4  ;;  %v4160_v39 = vld [vmem:[#allocation2 + $0x48] sm:$0xe]  ;;  %v4196_v43 = vsel %vm6860_vm4, %v5163_v1, %v4195_v4 }
 0x2ef   : > { %5835 = vmatprep.subr.bf16.mxu1 %v6231_v56  ;;  %v5149_v42 = vcombine.low %v3956_v45, %v3970_v22 }
 0x2f1   : > { %5828 = vmatmul.mubr.bf16.gmra.mrb[4].mxu1 %v6230_v31  ;;  %v3923_v31 = vrot.slane %v3922_v6, 4  ;;  %v6243_v6 = vld [vmem:[%s7328_s3 + $0x218] sm:$0xff]  }
 0x2f2   : > { %5836 = vmatpush3.bf16.msra.mxu1 %v6231_v56  ;;  %5847 = vmatprep.mubr.bf16.mxu1 %v5147_v35  ;;  %v3937_v56 = vrot.slane %v3936_v28, 4  ;;  %v6237_v35 = vld [vmem:[%s7328_s3 + $0x200] sm:$0xff]  }
 0x2f3   : > { %5837 = vmatprep.subr.bf16.mxu1 %v6232_v33  ;;  %v3928_v18 = vsel %vm6389_vm2, %v3923_v31, %v3927_v59  ;;  %v4187_v31 = vrot.slane %v7223_v62, 5 }
 0x2f4   : > { %v3942_v11 = vsel %vm6389_vm2, %v3937_v56, %v3941_v32  ;;  %v4191_v56 = vrot.slane %v7219_v55, 5  ;;  %v5164_v32 = vrot.slane %v4158_v26, 9  ;;  %v4159_v55 = vld [vmem:[#allocation2 + $0x40] sm:$0xe] }
 0x2f5   : > { %v5148_v57 = vcombine.low %v3928_v18, %v3942_v11  ;;  %v4188_v58 = vsel %vm6860_vm4, %v5161_v53, %v4187_v31  ;;  %v5165_v44 = vrot.slane %v4159_v55, 9 }
 0x2f6   : > { %5838 = vmatpush3.bf16.msra.mxu1 %v6232_v33  ;;  %v7234_v33 = vld [vmem:[#allocation2 + $0x4c] sm:$0x1]  ;;  %v4192_v36 = vsel %vm6860_vm4, %v5162_v27, %v4191_v56 }
 0x2f7   : > { %5839 = vmatprep.subr.bf16.mxu1 %v6233_v24  ;;  %v3995_v63 = vshll.u32 %v7234_v33, 16  ;;  %v5184_v59 = vcombine.low %v4188_v58, %v4192_v36  ;;  %v4207_v45 = vrot.slane %v7234_v33, 5 }
 0x2f9   : > { %v3997_v48 = vrot.slane %v3995_v63, 5 }
 0x2fa   : > { %5840 = vmatpush3.bf16.msra.mxu1 %v6233_v24  ;;  %v7239_v24 = vld [vmem:[#allocation2 + $0x44] sm:$0x1] }
 0x2fb   : > { %5841 = vmatprep.subr.bf16.mxu1 %v6234_v50  ;;  %v3998_v61 = vsel %vm6389_vm2, %v3993_v23, %v3997_v48  ;;  %v4203_v63 = vrot.slane %v7239_v24, 5 }
 0x2fd   : > { %v4204_v2 = vsel %vm6860_vm4, %v5165_v44, %v4203_v63 }
 0x2fe   : > { %5842 = vmatpush3.bf16.msra.mxu1 %v6234_v50  ;;  %v3981_v50 = vshll.u32 %v7239_v24, 16 }
 0x2ff   : > { %5843 = vmatprep.subr.bf16.mxu1 %v6235_v54 }
 0x302   : > { %5844 = vmatpush3.bf16.msra.mxu1 %v6235_v54  ;;  %v3983_v54 = vrot.slane %v3981_v50, 5  ;;  %v6255_v50 = vld [vmem:[%s7114_s11 + $0x10] sm:$0xff]  }
 0x303   : > { %5845 = vmatprep.subr.bf16.mxu1 %v6236_v14 }
 0x304   : > { %v3984_v28 = vsel %vm6389_vm2, %v3979_v5, %v3983_v54 }
 0x305   : > { %v5150_v3 = vcombine.low %v3984_v28, %v3998_v61 }
 0x306   : > { %5846 = vmatpush3.bf16.msra.mxu1 %v6236_v14  ;;  %v6249_v14 = vld [vmem:[%s7328_s3 + $0x230] sm:$0xff]  }
 0x307   : > { %5855 = vmatprep.subr.bf16.mxu1 %v6237_v35 }
 0x309   : > { %5848 = vmatmul.mubr.bf16.vlgmr.msra.gmra.mrb[0].mxu1 %v5148_v57 }
 0x30a   : > { %5851 = vmatprep.mubr.bf16.mxu1 %v5149_v42  ;;  %5856 = vmatpush3.bf16.msra.mxu1 %v6237_v35  ;;  %v4199_v35 = vrot.slane %v7226_v13, 5  ;;  %v5166_v13 = vrot.slane %v4160_v39, 9 }
 0x30b   : > { %5857 = vmatprep.subr.bf16.mxu1 %v6239_v47 }
 0x30c   : > { %v4200_v62 = vsel %vm6860_vm4, %v5164_v32, %v4199_v35  ;;  %v4208_v18 = vsel %vm6860_vm4, %v5166_v13, %v4207_v45 }
 0x30d   : > { %v5185_v11 = vcombine.low %v4196_v43, %v4200_v62  ;;  %v5186_v25 = vcombine.low %v4204_v2, %v4208_v18 }
 0x30e   : > { %5858 = vmatpush3.bf16.msra.mxu1 %v6239_v47 }
 0x30f   : > { %5859 = vmatprep.subr.bf16.mxu1 %v6241_v19 }
 0x311   : > { %5852 = vmatmul.mubr.bf16.gmra.mrb[4].mxu1 %v5150_v3 }
 0x312   : > { %5860 = vmatpush3.bf16.msra.mxu1 %v6241_v19  ;;  %5871 = vmatprep.mubr.bf16.mxu1 %v5183_v10 }
 0x313   : > { %5861 = vmatprep.subr.bf16.mxu1 %v6243_v6 }
 0x316   : > { %5862 = vmatpush3.bf16.msra.mxu1 %v6243_v6 }
 0x317   : > { %5863 = vmatprep.subr.bf16.mxu1 %v6245_v46 }
 0x31a   : > { %5864 = vmatpush3.bf16.msra.mxu1 %v6245_v46 }
 0x31b   : > { %5865 = vmatprep.subr.bf16.mxu1 %v6247_v12 }
 0x31e   : > { %5866 = vmatpush3.bf16.msra.mxu1 %v6247_v12 }
 0x31f   : > { %5867 = vmatprep.subr.bf16.mxu1 %v6249_v14 }
 0x322   : > { %5868 = vmatpush3.bf16.msra.mxu1 %v6249_v14 }
 0x323   : > { %5869 = vmatprep.subr.bf16.mxu1 %v6251_v17 }
 0x326   : > { %5870 = vmatpush3.bf16.msra.mxu1 %v6251_v17 }
 0x327   : > { %5903 = vmatprep.subr.bf16.mxu1 %v7003_v21 }
 0x329   : > { %5872 = vmatmul.mubr.bf16.vlgmr.msra.gmra.mrb[0].mxu1 %v5184_v59 }
 0x32a   : > { %5875 = vmatprep.mubr.bf16.mxu1 %v5185_v11  ;;  %5911 = vmatpush3.bf16.msra.mxu1 %v7003_v21 }
 0x32b   : > { %5904 = vmatprep.subr.bf16.mxu1 %v7012_v29 }
 0x32e   : > { %5912 = vmatpush3.bf16.msra.mxu1 %v7012_v29 }
 0x32f   : > { %5905 = vmatprep.subr.bf16.mxu1 %v7027_v34 }
 0x331   : > { %5876 = vmatmul.mubr.bf16.gmra.mrb[4].mxu1 %v5186_v25 }
 0x332   : > { %5913 = vmatpush3.bf16.msra.mxu1 %v7027_v34  ;;  %5899 = vmatprep.mubr.bf16.mxu1 %v6255_v50 }
 0x333   : > { %5906 = vmatprep.subr.bf16.mxu1 %v7036_v41 }
 0x336   : > { %5914 = vmatpush3.bf16.msra.mxu1 %v7036_v41 }
 0x337   : > { %5907 = vmatprep.subr.bf16.mxu1 %v7046_v60 }
 0x33a   : > { %5915 = vmatpush3.bf16.msra.mxu1 %v7046_v60 }
 0x33b   : > { %5908 = vmatprep.subr.bf16.mxu1 %v7060_v37 }
 0x33e   : > { %5916 = vmatpush3.bf16.msra.mxu1 %v7060_v37 }
 0x33f   : > { %5909 = vmatprep.subr.bf16.mxu1 %v7077_v16 }
 0x342   : > { %5917 = vmatpush3.bf16.msra.mxu1 %v7077_v16 }
 0x343   : > { %5910 = vmatprep.subr.bf16.mxu1 %v7095_v40 }
 0x346   : > { %5918 = vmatpush3.bf16.msra.mxu1 %v7095_v40 }
 0x349   : > { %5900 = vmatmul.mubr.bf16.vlgmr.msra.gmra.mrb[4].mxu1 %v6256_v30 }
 0x377   : > { %v5897_v21 = vpop.f32.mrb[8].mxu0 }
 0x378   : > { %v4493_v29 = vpop.f32.mrb[9].mxu0 }
 0x379   : > { %v5898_v34 = vpop.f32.mrb[10].mxu0 }
 0x37a   : > { %v4496_v41 = vpop.f32.mrb[11].mxu0 }
 0x3fc   : > { %v5873_v60 = vpop.f32.mrb[0].mxu1 }
 0x3fd   : > { %v5919_v37 = vadd.f32 %v5897_v21, %v5873_v60  ;;  %v4324_v33 = vpop.f32.mrb[1].mxu1 }
 0x3fe   : > { %v5920_v24 = vadd.f32 %v4493_v29, %v4324_v33  ;;  %v5874_v16 = vpop.f32.mrb[2].mxu1 }
 0x3ff   : > { %4534 = vst [vmem:[%s298_s16 + $0x10] sm:$0xff] %v5919_v37  ;;  %v5921_v57 = vadd.f32 %v5898_v34, %v5874_v16  ;;  %v4327_v22 = vpop.f32.mrb[3].mxu1 }
 0x400   : > { %4532 = vst [vmem:[%s298_s16] sm:$0xff] %v5920_v24  ;;  %v5922_v40 = vadd.f32 %v4496_v41, %v4327_v22 }
 0x401   : > { %4535 = vst [vmem:[%s298_s16 + $0x18] sm:$0xff] %v5921_v57 }
 0x402   : > { %4533 = vst [vmem:[%s298_s16 + $0x8] sm:$0xff] %v5922_v40 }
 0x41c   : > { %v5901_v47 = vpop.f32.mrb[4].mxu1 }
 0x41d   : > { %4538 = vst [vmem:[%s298_s16 + $0x30] sm:$0xff] %v5901_v47  ;;  %v4509_v42 = vpop.f32.mrb[5].mxu1 }
 0x41e   : > { %4536 = vst [vmem:[%s298_s16 + $0x20] sm:$0xff] %v4509_v42  ;;  %v5902_v5 = vpop.f32.mrb[6].mxu1 }
 0x41f   : > { %4539 = vst [vmem:[%s298_s16 + $0x38] sm:$0xff] %v5902_v5  ;;  %v4512_v23 = vpop.f32.mrb[7].mxu1 }
 0x420   : > { %4537 = vst [vmem:[%s298_s16 + $0x28] sm:$0xff] %v4512_v23 }
 0x421 PF: > { %s17_s24 = sadd.s32 1, %s6263_s24  }
 0x422   : > { %p14_p4 = scmp.ge.s32.totalorder %s17_s24, 4  }
 0x424   :  { %16 = sbr.rel (!%p14_p4) target bundleno = 1 (0x1), region = 104 }

</bundles_post_ra>
